<compile_context>
chip_gen: v7x
topology: tpu7x:2x2x1
jax: 0.10.0
libtpu: 0.0.40
codegen_flags: <defaults>
</compile_context>

<pallas_src>
import math
import jax
import jax.numpy as jnp
from jax import lax
from jax.experimental import pallas as pl
from jax.experimental.pallas import tpu as pltpu

# Small, module-consistent shapes (d_model / dim_feedforward scaled down; nhead kept at 8).
SEQ = 8          # L
BATCH = 2        # N
D_MODEL = 128    # E  (lane-dense: multiple of 128)
NHEAD = 8
DIM_FF = 256
EPS = 1e-6


def _rmsnorm(x, scale):
    ms = jnp.mean(x * x, axis=-1, keepdims=True)
    return x * lax.rsqrt(ms + EPS) * scale


def prenorm_block_kernel(x_ref, w_in_ref, b_in_ref, w_out_ref, b_out_ref,
                         w1_ref, b1_ref, w2_ref, b2_ref, s1_ref, s2_ref,
                         o_ref):
    L, N, E = x_ref.shape
    R = L * N
    hd = E // NHEAD
    inv_sqrt_hd = 1.0 / math.sqrt(hd)

    # Rows ordered (l, n): row i belongs to batch (i % N).
    x = x_ref[...].astype(jnp.float32).reshape(R, E)

    # ---- self-attention branch (pre-norm) ----
    h = _rmsnorm(x, s1_ref[...])                                          # (R, E)
    qkv = jnp.dot(h, w_in_ref[...],
                  preferred_element_type=jnp.float32) + b_in_ref[...]     # (R, 3E)
    q = qkv[:, :E] * inv_sqrt_hd
    k = qkv[:, E:2 * E]
    v = qkv[:, 2 * E:]

    # Head-batched attention: (NHEAD, R, hd) stacks, two batched matmuls.
    qs = jnp.stack([q[:, i * hd:(i + 1) * hd] for i in range(NHEAD)], axis=0)
    ks = jnp.stack([k[:, i * hd:(i + 1) * hd] for i in range(NHEAD)], axis=0)
    vs = jnp.stack([v[:, i * hd:(i + 1) * hd] for i in range(NHEAD)], axis=0)

    sc = jnp.einsum('hqd,hkd->hqk', qs, ks,
                    preferred_element_type=jnp.float32)                   # (H, R, R)

    # Mask cross-batch score entries so the whole batch runs in one invocation.
    ri = lax.broadcasted_iota(jnp.int32, (R, R), 0)
    ci = lax.broadcasted_iota(jnp.int32, (R, R), 1)
    bias = jnp.where((ri % N) == (ci % N), 0.0, -1e30).astype(jnp.float32)
    sc = sc + bias[None, :, :]

    m = jnp.max(sc, axis=-1, keepdims=True)
    p = jnp.exp(sc - m)
    p = p * pl.reciprocal(jnp.sum(p, axis=-1, keepdims=True), approx=True)

    ctx = jnp.einsum('hqk,hkd->hqd', p, vs,
                     preferred_element_type=jnp.float32)                  # (H, R, hd)
    attn = jnp.concatenate([ctx[i] for i in range(NHEAD)], axis=-1)       # (R, E)
    attn = jnp.dot(attn, w_out_ref[...],
                   preferred_element_type=jnp.float32) + b_out_ref[...]
    # TODO(synk): dropout / dropout1 / dropout2 omitted (identity in eval mode).
    x2 = x + attn

    # ---- feed-forward branch (pre-norm) ----
    h2 = _rmsnorm(x2, s2_ref[...])
    f = jnp.dot(h2, w1_ref[...],
                preferred_element_type=jnp.float32) + b1_ref[...]         # (R, FF)
    f = jnp.maximum(f, 0.0)
    f = jnp.dot(f, w2_ref[...],
                preferred_element_type=jnp.float32) + b2_ref[...]         # (R, E)

    o_ref[...] = (x2 + f).reshape(L, N, E).astype(o_ref.dtype)


def prenorm_transformer_block(x, params):
    """x: (L, N, E) float32 (PyTorch batch_first=False). Returns (L, N, E)."""
    L, N, E = x.shape
    FF = params["w1"].shape[0]
    assert E % NHEAD == 0

    # Pre-transpose weights once on the wrapper side: kernel does activations @ W
    # with no in-kernel transpose / relayout of the large operands.
    w_in_t = params["w_in"].T     # (E, 3E)
    w_out_t = params["w_out"].T   # (E, E)
    w1_t = params["w1"].T         # (E, FF)
    w2_t = params["w2"].T         # (FF, E)

    R = L * N
    hd = E // NHEAD
    flops = 2 * R * (3 * E * E + E * E + 2 * E * FF) + 2 * NHEAD * R * R * 2 * hd
    transcendentals = NHEAD * R * R + NHEAD * R + 2 * R
    bytes_accessed = 4 * (2 * R * E + 4 * E * E + 2 * E * FF + 5 * E + 3 * E + FF)

    vmem = lambda: pl.BlockSpec(memory_space=pltpu.MemorySpace.VMEM)
    return pl.pallas_call(
        prenorm_block_kernel,
        out_shape=jax.ShapeDtypeStruct((L, N, E), x.dtype),
        in_specs=[vmem() for _ in range(11)],
        out_specs=vmem(),
        cost_estimate=pl.CostEstimate(flops=flops,
                                      transcendentals=transcendentals,
                                      bytes_accessed=bytes_accessed),
    )(x, w_in_t, params["b_in"], w_out_t, params["b_out"],
      w1_t, params["b1"], w2_t, params["b2"], params["s1"], params["s2"])


def reference(x, params):
    """Pure-JAX reference of the same forward pass (for correctness check)."""
    L, N, E = x.shape
    hd = E // NHEAD

    def per_batch(xn):                               # xn: (L, E)
        h = _rmsnorm(xn, params["s1"][0])
        qkv = h @ params["w_in"].T + params["b_in"][0]
        q, k, v = qkv[:, :E], qkv[:, E:2 * E], qkv[:, 2 * E:]
        outs = []
        for hh in range(NHEAD):
            sl = slice(hh * hd, (hh + 1) * hd)
            sc = (q[:, sl] / math.sqrt(hd)) @ k[:, sl].T
            p = jax.nn.softmax(sc, axis=-1)
            outs.append(p @ v[:, sl])
        attn = jnp.concatenate(outs, axis=-1) @ params["w_out"].T + params["b_out"][0]
        x2 = xn + attn
        h2 = _rmsnorm(x2, params["s2"][0])
        f = jnp.maximum(h2 @ params["w1"].T + params["b1"][0], 0.0)
        f = f @ params["w2"].T + params["b2"][0]
        return x2 + f

    xt = jnp.transpose(x, (1, 0, 2))
    yt = jax.vmap(per_batch)(xt)
    return jnp.transpose(yt, (1, 0, 2))


def init_params(key, E, FF):
    ks = jax.random.split(key, 8)
    sd = 0.02
    return {
        "w_in":  sd * jax.random.normal(ks[0], (3 * E, E), jnp.float32),
        "b_in":  sd * jax.random.normal(ks[1], (1, 3 * E), jnp.float32),
        "w_out": sd * jax.random.normal(ks[2], (E, E), jnp.float32),
        "b_out": sd * jax.random.normal(ks[3], (1, E), jnp.float32),
        "w1":    sd * jax.random.normal(ks[4], (FF, E), jnp.float32),
        "b1":    sd * jax.random.normal(ks[5], (1, FF), jnp.float32),
        "w2":    sd * jax.random.normal(ks[6], (E, FF), jnp.float32),
        "b2":    sd * jax.random.normal(ks[7], (1, E), jnp.float32),
        "s1":    jnp.ones((1, E), jnp.float32),
        "s2":    jnp.ones((1, E), jnp.float32),
    }


if __name__ == "__main__":
    key = jax.random.PRNGKey(0)
    kx, kp = jax.random.split(key)
    x = jax.random.normal(kx, (SEQ, BATCH, D_MODEL), jnp.float32)  # (L, N, E)
    params = init_params(kp, D_MODEL, DIM_FF)

    y = prenorm_transformer_block(x, params)
    y = jax.block_until_ready(y)

    y_ref = reference(x, params)
    assert y.shape == x.shape
    assert jnp.allclose(y, y_ref, atol=1e-3, rtol=1e-3), \
        f"max err {jnp.max(jnp.abs(y - y_ref))}"
    print("KERNEL_OK")
</pallas_src>

<mosaic_0001>
module attributes {stable_mosaic.version = 11 : i64} {
  func.func @prenorm_block_kernel(%arg0: memref<8x2x128xf32, #tpu.memory_space<vmem>>, %arg1: memref<128x384xf32, #tpu.memory_space<vmem>>, %arg2: memref<1x384xf32, #tpu.memory_space<vmem>>, %arg3: memref<128x128xf32, #tpu.memory_space<vmem>>, %arg4: memref<1x128xf32, #tpu.memory_space<vmem>>, %arg5: memref<128x256xf32, #tpu.memory_space<vmem>>, %arg6: memref<1x256xf32, #tpu.memory_space<vmem>>, %arg7: memref<256x128xf32, #tpu.memory_space<vmem>>, %arg8: memref<1x128xf32, #tpu.memory_space<vmem>>, %arg9: memref<1x128xf32, #tpu.memory_space<vmem>>, %arg10: memref<1x128xf32, #tpu.memory_space<vmem>>, %arg11: memref<8x2x128xf32, #tpu.memory_space<vmem>>) attributes {dimension_semantics = [], scalar_prefetch = 0 : i64, scratch_operands = 0 : i64, tpu.core_type = #tpu.core_type<tc>} {
    %c0 = arith.constant 0 : index
    %c0_0 = arith.constant 0 : index
    %c0_1 = arith.constant 0 : index
    %0 = vector.load %arg0[%c0, %c0_0, %c0_1] : memref<8x2x128xf32, #tpu.memory_space<vmem>>, vector<8x2x128xf32>
    %1 = vector.shape_cast %0 : vector<8x2x128xf32> to vector<16x128xf32>
    %c0_2 = arith.constant 0 : index
    %c0_3 = arith.constant 0 : index
    %2 = vector.load %arg9[%c0_2, %c0_3] : memref<1x128xf32, #tpu.memory_space<vmem>>, vector<1x128xf32>
    %3 = arith.mulf %1, %1 : vector<16x128xf32>
    %cst = arith.constant dense<0.000000e+00> : vector<16xf32>
    %4 = vector.multi_reduction <add>, %3, %cst [1] : vector<16x128xf32> to vector<16xf32>
    %5 = vector.shape_cast %4 : vector<16xf32> to vector<16x1xf32>
    %cst_4 = arith.constant 1.280000e+02 : f32
    %6 = vector.broadcast %cst_4 : f32 to vector<16x1xf32>
    %7 = arith.divf %5, %6 : vector<16x1xf32>
    %cst_5 = arith.constant 9.99999997E-7 : f32
    %8 = vector.broadcast %cst_5 : f32 to vector<16x1xf32>
    %9 = arith.addf %7, %8 : vector<16x1xf32>
    %10 = math.rsqrt %9 : vector<16x1xf32>
    %11 = vector.broadcast %10 : vector<16x1xf32> to vector<16x128xf32>
    %12 = arith.mulf %1, %11 : vector<16x128xf32>
    %13 = vector.broadcast %2 : vector<1x128xf32> to vector<16x128xf32>
    %14 = arith.mulf %12, %13 : vector<16x128xf32>
    %c0_6 = arith.constant 0 : index
    %c0_7 = arith.constant 0 : index
    %15 = vector.load %arg1[%c0_6, %c0_7] : memref<128x384xf32, #tpu.memory_space<vmem>>, vector<128x384xf32>
    %cst_8 = arith.constant dense<0.000000e+00> : vector<16x384xf32>
    %16 = tpu.matmul %14, %15, %cst_8 {dimension_numbers = #tpu.dot_dimension_numbers<[1], [0], [0], [1], [0, 0, 1, 1], [], []>} : vector<16x128xf32>, vector<128x384xf32>, vector<16x384xf32> -> vector<16x384xf32>
    %c0_9 = arith.constant 0 : index
    %c0_10 = arith.constant 0 : index
    %17 = vector.load %arg2[%c0_9, %c0_10] : memref<1x384xf32, #tpu.memory_space<vmem>>, vector<1x384xf32>
    %18 = vector.broadcast %17 : vector<1x384xf32> to vector<16x384xf32>
    %19 = arith.addf %16, %18 : vector<16x384xf32>
    %20 = vector.extract_strided_slice %19 {offsets = [0, 0], sizes = [16, 128], strides = [1, 1]} : vector<16x384xf32> to vector<16x128xf32>
    %cst_11 = arith.constant 2.500000e-01 : f32
    %21 = vector.broadcast %cst_11 : f32 to vector<16x128xf32>
    %22 = arith.mulf %20, %21 : vector<16x128xf32>
    %23 = vector.extract_strided_slice %19 {offsets = [0, 128], sizes = [16, 128], strides = [1, 1]} : vector<16x384xf32> to vector<16x128xf32>
    %24 = vector.extract_strided_slice %19 {offsets = [0, 256], sizes = [16, 128], strides = [1, 1]} : vector<16x384xf32> to vector<16x128xf32>
    %25 = vector.extract_strided_slice %22 {offsets = [0, 0], sizes = [16, 16], strides = [1, 1]} : vector<16x128xf32> to vector<16x16xf32>
    %26 = vector.extract_strided_slice %22 {offsets = [0, 16], sizes = [16, 16], strides = [1, 1]} : vector<16x128xf32> to vector<16x16xf32>
    %27 = vector.extract_strided_slice %22 {offsets = [0, 32], sizes = [16, 16], strides = [1, 1]} : vector<16x128xf32> to vector<16x16xf32>
    %28 = vector.extract_strided_slice %22 {offsets = [0, 48], sizes = [16, 16], strides = [1, 1]} : vector<16x128xf32> to vector<16x16xf32>
    %29 = vector.extract_strided_slice %22 {offsets = [0, 64], sizes = [16, 16], strides = [1, 1]} : vector<16x128xf32> to vector<16x16xf32>
    %30 = vector.extract_strided_slice %22 {offsets = [0, 80], sizes = [16, 16], strides = [1, 1]} : vector<16x128xf32> to vector<16x16xf32>
    %31 = vector.extract_strided_slice %22 {offsets = [0, 96], sizes = [16, 16], strides = [1, 1]} : vector<16x128xf32> to vector<16x16xf32>
    %32 = vector.extract_strided_slice %22 {offsets = [0, 112], sizes = [16, 16], strides = [1, 1]} : vector<16x128xf32> to vector<16x16xf32>
    %33 = vector.shape_cast %25 : vector<16x16xf32> to vector<1x16x16xf32>
    %34 = vector.shape_cast %26 : vector<16x16xf32> to vector<1x16x16xf32>
    %35 = vector.shape_cast %27 : vector<16x16xf32> to vector<1x16x16xf32>
    %36 = vector.shape_cast %28 : vector<16x16xf32> to vector<1x16x16xf32>
    %37 = vector.shape_cast %29 : vector<16x16xf32> to vector<1x16x16xf32>
    %38 = vector.shape_cast %30 : vector<16x16xf32> to vector<1x16x16xf32>
    %39 = vector.shape_cast %31 : vector<16x16xf32> to vector<1x16x16xf32>
    %40 = vector.shape_cast %32 : vector<16x16xf32> to vector<1x16x16xf32>
    %41 = tpu.concatenate %33, %34, %35, %36, %37, %38, %39, %40 in 0 : vector<1x16x16xf32>, vector<1x16x16xf32>, vector<1x16x16xf32>, vector<1x16x16xf32>, vector<1x16x16xf32>, vector<1x16x16xf32>, vector<1x16x16xf32>, vector<1x16x16xf32> -> vector<8x16x16xf32>
    %42 = vector.extract_strided_slice %23 {offsets = [0, 0], sizes = [16, 16], strides = [1, 1]} : vector<16x128xf32> to vector<16x16xf32>
    %43 = vector.extract_strided_slice %23 {offsets = [0, 16], sizes = [16, 16], strides = [1, 1]} : vector<16x128xf32> to vector<16x16xf32>
    %44 = vector.extract_strided_slice %23 {offsets = [0, 32], sizes = [16, 16], strides = [1, 1]} : vector<16x128xf32> to vector<16x16xf32>
    %45 = vector.extract_strided_slice %23 {offsets = [0, 48], sizes = [16, 16], strides = [1, 1]} : vector<16x128xf32> to vector<16x16xf32>
    %46 = vector.extract_strided_slice %23 {offsets = [0, 64], sizes = [16, 16], strides = [1, 1]} : vector<16x128xf32> to vector<16x16xf32>
    %47 = vector.extract_strided_slice %23 {offsets = [0, 80], sizes = [16, 16], strides = [1, 1]} : vector<16x128xf32> to vector<16x16xf32>
    %48 = vector.extract_strided_slice %23 {offsets = [0, 96], sizes = [16, 16], strides = [1, 1]} : vector<16x128xf32> to vector<16x16xf32>
    %49 = vector.extract_strided_slice %23 {offsets = [0, 112], sizes = [16, 16], strides = [1, 1]} : vector<16x128xf32> to vector<16x16xf32>
    %50 = vector.shape_cast %42 : vector<16x16xf32> to vector<1x16x16xf32>
    %51 = vector.shape_cast %43 : vector<16x16xf32> to vector<1x16x16xf32>
    %52 = vector.shape_cast %44 : vector<16x16xf32> to vector<1x16x16xf32>
    %53 = vector.shape_cast %45 : vector<16x16xf32> to vector<1x16x16xf32>
    %54 = vector.shape_cast %46 : vector<16x16xf32> to vector<1x16x16xf32>
    %55 = vector.shape_cast %47 : vector<16x16xf32> to vector<1x16x16xf32>
    %56 = vector.shape_cast %48 : vector<16x16xf32> to vector<1x16x16xf32>
    %57 = vector.shape_cast %49 : vector<16x16xf32> to vector<1x16x16xf32>
    %58 = tpu.concatenate %50, %51, %52, %53, %54, %55, %56, %57 in 0 : vector<1x16x16xf32>, vector<1x16x16xf32>, vector<1x16x16xf32>, vector<1x16x16xf32>, vector<1x16x16xf32>, vector<1x16x16xf32>, vector<1x16x16xf32>, vector<1x16x16xf32> -> vector<8x16x16xf32>
    %59 = vector.extract_strided_slice %24 {offsets = [0, 0], sizes = [16, 16], strides = [1, 1]} : vector<16x128xf32> to vector<16x16xf32>
    %60 = vector.extract_strided_slice %24 {offsets = [0, 16], sizes = [16, 16], strides = [1, 1]} : vector<16x128xf32> to vector<16x16xf32>
    %61 = vector.extract_strided_slice %24 {offsets = [0, 32], sizes = [16, 16], strides = [1, 1]} : vector<16x128xf32> to vector<16x16xf32>
    %62 = vector.extract_strided_slice %24 {offsets = [0, 48], sizes = [16, 16], strides = [1, 1]} : vector<16x128xf32> to vector<16x16xf32>
    %63 = vector.extract_strided_slice %24 {offsets = [0, 64], sizes = [16, 16], strides = [1, 1]} : vector<16x128xf32> to vector<16x16xf32>
    %64 = vector.extract_strided_slice %24 {offsets = [0, 80], sizes = [16, 16], strides = [1, 1]} : vector<16x128xf32> to vector<16x16xf32>
    %65 = vector.extract_strided_slice %24 {offsets = [0, 96], sizes = [16, 16], strides = [1, 1]} : vector<16x128xf32> to vector<16x16xf32>
    %66 = vector.extract_strided_slice %24 {offsets = [0, 112], sizes = [16, 16], strides = [1, 1]} : vector<16x128xf32> to vector<16x16xf32>
    %67 = vector.shape_cast %59 : vector<16x16xf32> to vector<1x16x16xf32>
    %68 = vector.shape_cast %60 : vector<16x16xf32> to vector<1x16x16xf32>
    %69 = vector.shape_cast %61 : vector<16x16xf32> to vector<1x16x16xf32>
    %70 = vector.shape_cast %62 : vector<16x16xf32> to vector<1x16x16xf32>
    %71 = vector.shape_cast %63 : vector<16x16xf32> to vector<1x16x16xf32>
    %72 = vector.shape_cast %64 : vector<16x16xf32> to vector<1x16x16xf32>
    %73 = vector.shape_cast %65 : vector<16x16xf32> to vector<1x16x16xf32>
    %74 = vector.shape_cast %66 : vector<16x16xf32> to vector<1x16x16xf32>
    %75 = tpu.concatenate %67, %68, %69, %70, %71, %72, %73, %74 in 0 : vector<1x16x16xf32>, vector<1x16x16xf32>, vector<1x16x16xf32>, vector<1x16x16xf32>, vector<1x16x16xf32>, vector<1x16x16xf32>, vector<1x16x16xf32>, vector<1x16x16xf32> -> vector<8x16x16xf32>
    "tpu.trace_start"() <{level = 10 : i32, message = "hqd,hkd->hqk"}> : () -> ()
    %cst_12 = arith.constant dense<0.000000e+00> : vector<8x16x16xf32>
    %76 = tpu.matmul %41, %58, %cst_12 {dimension_numbers = #tpu.dot_dimension_numbers<[2], [2], [1], [1], [0, 0, 0, 1, 1, 1], [0], [0]>} : vector<8x16x16xf32>, vector<8x16x16xf32>, vector<8x16x16xf32> -> vector<8x16x16xf32>
    "tpu.trace_stop"() : () -> ()
    %77 = tpu.iota {dimensions = array<i32: 0>} : vector<16x16xi32>
    %78 = tpu.iota {dimensions = array<i32: 1>} : vector<16x16xi32>
    %c2_i32 = arith.constant 2 : i32
    %c0_i32 = arith.constant 0 : i32
    %79 = arith.cmpi eq, %c2_i32, %c0_i32 : i32
    %c1_i32 = arith.constant 1 : i32
    %80 = arith.select %79, %c1_i32, %c2_i32 : i32
    %81 = vector.broadcast %80 : i32 to vector<16x16xi32>
    %82 = arith.remsi %77, %81 : vector<16x16xi32>
    %c0_i32_13 = arith.constant 0 : i32
    %83 = vector.broadcast %c0_i32_13 : i32 to vector<16x16xi32>
    %84 = arith.cmpi ne, %82, %83 : vector<16x16xi32>
    %c0_i32_14 = arith.constant 0 : i32
    %85 = vector.broadcast %c0_i32_14 : i32 to vector<16x16xi32>
    %86 = arith.cmpi slt, %82, %85 : vector<16x16xi32>
    %c0_i32_15 = arith.constant 0 : i32
    %87 = arith.cmpi slt, %80, %c0_i32_15 : i32
    %88 = vector.broadcast %87 : i1 to vector<16x16xi1>
    %89 = vector.broadcast %88 : vector<16x16xi1> to vector<16x16xi1>
    %90 = arith.xori %86, %89 : vector<16x16xi1>
    %91 = arith.andi %90, %84 : vector<16x16xi1>
    %92 = vector.broadcast %80 : i32 to vector<16x16xi32>
    %93 = arith.addi %82, %92 : vector<16x16xi32>
    %94 = arith.select %91, %93, %82 : vector<16x16xi1>, vector<16x16xi32>
    %c2_i32_16 = arith.constant 2 : i32
    %c0_i32_17 = arith.constant 0 : i32
    %95 = arith.cmpi eq, %c2_i32_16, %c0_i32_17 : i32
    %c1_i32_18 = arith.constant 1 : i32
    %96 = arith.select %95, %c1_i32_18, %c2_i32_16 : i32
    %97 = vector.broadcast %96 : i32 to vector<16x16xi32>
    %98 = arith.remsi %78, %97 : vector<16x16xi32>
    %c0_i32_19 = arith.constant 0 : i32
    %99 = vector.broadcast %c0_i32_19 : i32 to vector<16x16xi32>
    %100 = arith.cmpi ne, %98, %99 : vector<16x16xi32>
    %c0_i32_20 = arith.constant 0 : i32
    %101 = vector.broadcast %c0_i32_20 : i32 to vector<16x16xi32>
    %102 = arith.cmpi slt, %98, %101 : vector<16x16xi32>
    %c0_i32_21 = arith.constant 0 : i32
    %103 = arith.cmpi slt, %96, %c0_i32_21 : i32
    %104 = vector.broadcast %103 : i1 to vector<16x16xi1>
    %105 = vector.broadcast %104 : vector<16x16xi1> to vector<16x16xi1>
    %106 = arith.xori %102, %105 : vector<16x16xi1>
    %107 = arith.andi %106, %100 : vector<16x16xi1>
    %108 = vector.broadcast %96 : i32 to vector<16x16xi32>
    %109 = arith.addi %98, %108 : vector<16x16xi32>
    %110 = arith.select %107, %109, %98 : vector<16x16xi1>, vector<16x16xi32>
    %111 = arith.cmpi eq, %94, %110 : vector<16x16xi32>
    %cst_22 = arith.constant 0.000000e+00 : f32
    %cst_23 = arith.constant -1.000000e+30 : f32
    %112 = vector.broadcast %cst_22 : f32 to vector<16x16xf32>
    %113 = vector.broadcast %cst_23 : f32 to vector<16x16xf32>
    %114 = arith.select %111, %112, %113 : vector<16x16xi1>, vector<16x16xf32>
    %115 = vector.shape_cast %114 : vector<16x16xf32> to vector<1x16x16xf32>
    %116 = vector.broadcast %115 : vector<1x16x16xf32> to vector<8x16x16xf32>
    %117 = arith.addf %76, %116 : vector<8x16x16xf32>
    %cst_24 = arith.constant dense<0xFF800000> : vector<8x16xf32>
    %118 = vector.multi_reduction <maximumf>, %117, %cst_24 [2] : vector<8x16x16xf32> to vector<8x16xf32>
    %119 = vector.shape_cast %118 : vector<8x16xf32> to vector<8x16x1xf32>
    %120 = vector.broadcast %119 : vector<8x16x1xf32> to vector<8x16x16xf32>
    %121 = arith.subf %117, %120 : vector<8x16x16xf32>
    %122 = math.exp %121 : vector<8x16x16xf32>
    %cst_25 = arith.constant dense<0.000000e+00> : vector<8x16xf32>
    %123 = vector.multi_reduction <add>, %122, %cst_25 [2] : vector<8x16x16xf32> to vector<8x16xf32>
    %124 = vector.shape_cast %123 : vector<8x16xf32> to vector<8x16x1xf32>
    %125 = tpu.reciprocal %124 {approx = true} : vector<8x16x1xf32> -> vector<8x16x1xf32>
    %126 = vector.broadcast %125 : vector<8x16x1xf32> to vector<8x16x16xf32>
    %127 = arith.mulf %122, %126 : vector<8x16x16xf32>
    "tpu.trace_start"() <{level = 10 : i32, message = "hqk,hkd->hqd"}> : () -> ()
    %cst_26 = arith.constant dense<0.000000e+00> : vector<8x16x16xf32>
    %128 = tpu.matmul %127, %75, %cst_26 {dimension_numbers = #tpu.dot_dimension_numbers<[2], [1], [1], [2], [0, 0, 0, 1, 1, 2], [0], [0]>} : vector<8x16x16xf32>, vector<8x16x16xf32>, vector<8x16x16xf32> -> vector<8x16x16xf32>
    "tpu.trace_stop"() : () -> ()
    %129 = vector.extract_strided_slice %128 {offsets = [0, 0, 0], sizes = [1, 16, 16], strides = [1, 1, 1]} : vector<8x16x16xf32> to vector<1x16x16xf32>
    %130 = vector.shape_cast %129 : vector<1x16x16xf32> to vector<16x16xf32>
    %131 = vector.extract_strided_slice %128 {offsets = [1, 0, 0], sizes = [1, 16, 16], strides = [1, 1, 1]} : vector<8x16x16xf32> to vector<1x16x16xf32>
    %132 = vector.shape_cast %131 : vector<1x16x16xf32> to vector<16x16xf32>
    %133 = vector.extract_strided_slice %128 {offsets = [2, 0, 0], sizes = [1, 16, 16], strides = [1, 1, 1]} : vector<8x16x16xf32> to vector<1x16x16xf32>
    %134 = vector.shape_cast %133 : vector<1x16x16xf32> to vector<16x16xf32>
    %135 = vector.extract_strided_slice %128 {offsets = [3, 0, 0], sizes = [1, 16, 16], strides = [1, 1, 1]} : vector<8x16x16xf32> to vector<1x16x16xf32>
    %136 = vector.shape_cast %135 : vector<1x16x16xf32> to vector<16x16xf32>
    %137 = vector.extract_strided_slice %128 {offsets = [4, 0, 0], sizes = [1, 16, 16], strides = [1, 1, 1]} : vector<8x16x16xf32> to vector<1x16x16xf32>
    %138 = vector.shape_cast %137 : vector<1x16x16xf32> to vector<16x16xf32>
    %139 = vector.extract_strided_slice %128 {offsets = [5, 0, 0], sizes = [1, 16, 16], strides = [1, 1, 1]} : vector<8x16x16xf32> to vector<1x16x16xf32>
    %140 = vector.shape_cast %139 : vector<1x16x16xf32> to vector<16x16xf32>
    %141 = vector.extract_strided_slice %128 {offsets = [6, 0, 0], sizes = [1, 16, 16], strides = [1, 1, 1]} : vector<8x16x16xf32> to vector<1x16x16xf32>
    %142 = vector.shape_cast %141 : vector<1x16x16xf32> to vector<16x16xf32>
    %143 = vector.extract_strided_slice %128 {offsets = [7, 0, 0], sizes = [1, 16, 16], strides = [1, 1, 1]} : vector<8x16x16xf32> to vector<1x16x16xf32>
    %144 = vector.shape_cast %143 : vector<1x16x16xf32> to vector<16x16xf32>
    %145 = tpu.concatenate %130, %132, %134, %136, %138, %140, %142, %144 in 1 : vector<16x16xf32>, vector<16x16xf32>, vector<16x16xf32>, vector<16x16xf32>, vector<16x16xf32>, vector<16x16xf32>, vector<16x16xf32>, vector<16x16xf32> -> vector<16x128xf32>
    %c0_27 = arith.constant 0 : index
    %c0_28 = arith.constant 0 : index
    %146 = vector.load %arg3[%c0_27, %c0_28] : memref<128x128xf32, #tpu.memory_space<vmem>>, vector<128x128xf32>
    %cst_29 = arith.constant dense<0.000000e+00> : vector<16x128xf32>
    %147 = tpu.matmul %145, %146, %cst_29 {dimension_numbers = #tpu.dot_dimension_numbers<[1], [0], [0], [1], [0, 0, 1, 1], [], []>} : vector<16x128xf32>, vector<128x128xf32>, vector<16x128xf32> -> vector<16x128xf32>
    %c0_30 = arith.constant 0 : index
    %c0_31 = arith.constant 0 : index
    %148 = vector.load %arg4[%c0_30, %c0_31] : memref<1x128xf32, #tpu.memory_space<vmem>>, vector<1x128xf32>
    %149 = vector.broadcast %148 : vector<1x128xf32> to vector<16x128xf32>
    %150 = arith.addf %147, %149 : vector<16x128xf32>
    %151 = arith.addf %1, %150 : vector<16x128xf32>
    %c0_32 = arith.constant 0 : index
    %c0_33 = arith.constant 0 : index
    %152 = vector.load %arg10[%c0_32, %c0_33] : memref<1x128xf32, #tpu.memory_space<vmem>>, vector<1x128xf32>
    %153 = arith.mulf %151, %151 : vector<16x128xf32>
    %cst_34 = arith.constant dense<0.000000e+00> : vector<16xf32>
    %154 = vector.multi_reduction <add>, %153, %cst_34 [1] : vector<16x128xf32> to vector<16xf32>
    %155 = vector.shape_cast %154 : vector<16xf32> to vector<16x1xf32>
    %cst_35 = arith.constant 1.280000e+02 : f32
    %156 = vector.broadcast %cst_35 : f32 to vector<16x1xf32>
    %157 = arith.divf %155, %156 : vector<16x1xf32>
    %cst_36 = arith.constant 9.99999997E-7 : f32
    %158 = vector.broadcast %cst_36 : f32 to vector<16x1xf32>
    %159 = arith.addf %157, %158 : vector<16x1xf32>
    %160 = math.rsqrt %159 : vector<16x1xf32>
    %161 = vector.broadcast %160 : vector<16x1xf32> to vector<16x128xf32>
    %162 = arith.mulf %151, %161 : vector<16x128xf32>
    %163 = vector.broadcast %152 : vector<1x128xf32> to vector<16x128xf32>
    %164 = arith.mulf %162, %163 : vector<16x128xf32>
    %c0_37 = arith.constant 0 : index
    %c0_38 = arith.constant 0 : index
    %165 = vector.load %arg5[%c0_37, %c0_38] : memref<128x256xf32, #tpu.memory_space<vmem>>, vector<128x256xf32>
    %cst_39 = arith.constant dense<0.000000e+00> : vector<16x256xf32>
    %166 = tpu.matmul %164, %165, %cst_39 {dimension_numbers = #tpu.dot_dimension_numbers<[1], [0], [0], [1], [0, 0, 1, 1], [], []>} : vector<16x128xf32>, vector<128x256xf32>, vector<16x256xf32> -> vector<16x256xf32>
    %c0_40 = arith.constant 0 : index
    %c0_41 = arith.constant 0 : index
    %167 = vector.load %arg6[%c0_40, %c0_41] : memref<1x256xf32, #tpu.memory_space<vmem>>, vector<1x256xf32>
    %168 = vector.broadcast %167 : vector<1x256xf32> to vector<16x256xf32>
    %169 = arith.addf %166, %168 : vector<16x256xf32>
    %cst_42 = arith.constant 0.000000e+00 : f32
    %170 = vector.broadcast %cst_42 : f32 to vector<16x256xf32>
    %171 = arith.maximumf %169, %170 : vector<16x256xf32>
    %c0_43 = arith.constant 0 : index
    %c0_44 = arith.constant 0 : index
    %172 = vector.load %arg7[%c0_43, %c0_44] : memref<256x128xf32, #tpu.memory_space<vmem>>, vector<256x128xf32>
    %cst_45 = arith.constant dense<0.000000e+00> : vector<16x128xf32>
    %173 = tpu.matmul %171, %172, %cst_45 {dimension_numbers = #tpu.dot_dimension_numbers<[1], [0], [0], [1], [0, 0, 1, 1], [], []>} : vector<16x256xf32>, vector<256x128xf32>, vector<16x128xf32> -> vector<16x128xf32>
    %c0_46 = arith.constant 0 : index
    %c0_47 = arith.constant 0 : index
    %174 = vector.load %arg8[%c0_46, %c0_47] : memref<1x128xf32, #tpu.memory_space<vmem>>, vector<1x128xf32>
    %175 = vector.broadcast %174 : vector<1x128xf32> to vector<16x128xf32>
    %176 = arith.addf %173, %175 : vector<16x128xf32>
    %177 = arith.addf %151, %176 : vector<16x128xf32>
    %178 = vector.shape_cast %177 : vector<16x128xf32> to vector<8x2x128xf32>
    %c0_48 = arith.constant 0 : index
    %c0_49 = arith.constant 0 : index
    %c0_50 = arith.constant 0 : index
    %179 = vector.load %arg11[%c0_48, %c0_49, %c0_50] : memref<8x2x128xf32, #tpu.memory_space<vmem>>, vector<8x2x128xf32>
    tpu.vector_store %arg11[%c0_48, %c0_49, %c0_50], %178 {strides = array<i32>} : memref<8x2x128xf32, #tpu.memory_space<vmem>>, vector<8x2x128xf32>,
    return
  }
}

</mosaic_0001>

<bundles_post_ra>
// kernel: tpu_custom_call.1
= control target key start
LH: loop header
LB: loop body
LE: loop exit
PB: predicated region body
PF: predicated region fallthrough
CT: control target
= control target key end

     0   :  { %16 = vsyncpa [#allocation3], 0  ;;  %s4555_s0 = inlined_call_operand.hbm [shape: f32[8,2,128], index: 0, kind: input, shape index: {}]   ;;  %s4556_s1 = inlined_call_operand.hbm [shape: f32[128,384], index: 1, kind: input, shape index: {}]   ;;  %s4557_s2 = inlined_call_operand.vmem [shape: f32[1,384], index: 2, kind: input, shape index: {}]   ;;  %s4558_s3 = inlined_call_operand.hbm [shape: f32[128,128], index: 3, kind: input, shape index: {}]   ;;  %s4559_s4 = inlined_call_operand.vmem [shape: f32[1,128], index: 4, kind: input, shape index: {}]   ;;  %s4560_s5 = inlined_call_operand.hbm [shape: f32[128,256], index: 5, kind: input, shape index: {}]   ;;  %s4561_s6 = inlined_call_operand.vmem [shape: f32[1,256], index: 6, kind: input, shape index: {}]   ;;  %s4562_s7 = inlined_call_operand.hbm [shape: f32[256,128], index: 7, kind: input, shape index: {}]   ;;  %s4563_s8 = inlined_call_operand.vmem [shape: f32[1,128], index: 8, kind: input, shape index: {}]   ;;  %s4564_s9 = inlined_call_operand.vmem [shape: f32[1,128], index: 9, kind: input, shape index: {}]   ;;  %s4565_s10 = inlined_call_operand.vmem [shape: f32[1,128], index: 10, kind: input, shape index: {}]   ;;  %s4566_s11 = inlined_call_operand.hbm [shape: f32[8,2,128], index: 11, kind: output, shape index: {}]  }
   0x1   :  { %17 = vsyncpa [#allocation6], 0 }
   0x2   :  { %18 = vsyncpa [#allocation9], 0 }
   0x3   :  { %19 = vsyncpa [#allocation4], 0  ;;  %s3910_s17 = smov [#allocation5]   ;;  %s3770_s21 = scalar_lea.hbm %s4556_s1, 6144 }
   0x4   :  { %s37_s18 = sshll.u32 %s3910_s17, 4  ;;  %p3771_p0 = scmp.ne.s32.totalorder %s4556_s1, %s3770_s21  ;;  %s38_s18 = int_to_ptr.vmem [resolvable:$true] %s37_s18 }
   0x5   :  { %p3774_p1 = scmp.lt.u32.totalorder %s3770_s21, %s4556_s1 }
   0x7   :  { %p3776_p2 = pnand %p3774_p1, %p3771_p0 }
   0x9   :  { %3779 = shalt.err (!%p3776_p2)
}
   0xa   :  { %s3780_s26 = scalar_lea.vmem %s38_s18, 6144  ;;  %p3785_p4 = scmp.lt.s32.totalorder %s38_s18, %s38_s18 }
   0xb   :  { %p3781_p3 = scmp.ne.s32.totalorder %s38_s18, %s3780_s26  ;;  %p3786_p5 = scmp.lt.s32.totalorder %s3780_s26, %s3780_s26 }
   0xd   :  { %p3787_p6 = por %p3786_p5, %p3785_p4 }
   0xf   :  { %p3788_p7 = pnand %p3787_p6, %p3781_p3 }
  0x11   :  { %3791 = shalt.err (!%p3788_p7)
}
  0x12   :  { %s3911_s27 = smov 384   ;;  %s3912_s28 = smov 24  }
  0x13   :  { %43 = dma.hbm_to_vmem [thread:$0]  %s4556_s1, 6144, %s38_s18, [#allocation6], %s3911_s27, %s3911_s27, %s3912_s28  }
  0x14   :  { %s3913_s12 = smov [#allocation8]   ;;  %s3792_s16 = scalar_lea.hbm %s4560_s5, 4096 }
  0x15   :  { %s65_s13 = sshll.u32 %s3913_s12, 4  ;;  %p3793_p8 = scmp.ne.s32.totalorder %s4560_s5, %s3792_s16  ;;  %s66_s13 = int_to_ptr.vmem [resolvable:$true] %s65_s13 }
  0x16   :  { %p3796_p9 = scmp.lt.u32.totalorder %s3792_s16, %s4560_s5 }
  0x18   :  { %p3798_p10 = pnand %p3796_p9, %p3793_p8 }
  0x1a   :  { %3801 = shalt.err (!%p3798_p10)
}
  0x1b   :  { %s3802_s22 = scalar_lea.vmem %s66_s13, 4096  ;;  %p3807_p12 = scmp.lt.s32.totalorder %s66_s13, %s66_s13 }
  0x1c   :  { %p3803_p11 = scmp.ne.s32.totalorder %s66_s13, %s3802_s22  ;;  %p3808_p13 = scmp.lt.s32.totalorder %s3802_s22, %s3802_s22 }
  0x1e   :  { %p3809_p0 = por %p3808_p13, %p3807_p12 }
  0x20   :  { %p3810_p1 = pnand %p3809_p0, %p3803_p11 }
  0x22   :  { %3813 = shalt.err (!%p3810_p1)
}
  0x23   :  { %s3914_s1 = smov 256   ;;  %s3915_s18 = smov 16  }
  0x24   :  { %71 = dma.hbm_to_vmem [thread:$0]  %s4560_s5, 4096, %s66_s13, [#allocation9], %s3914_s1, %s3914_s1, %s3915_s18  }
  0x25   :  { %s3916_s25 = smov [#allocation2]   ;;  %s3814_s29 = scalar_lea.hbm %s4555_s0, 256 }
  0x26   :  { %s25_s26 = sshll.u32 %s3916_s25, 4  ;;  %p3815_p2 = scmp.ne.s32.totalorder %s4555_s0, %s3814_s29  ;;  %s26_s26 = int_to_ptr.vmem [resolvable:$true] %s25_s26 }
  0x27   :  { %p3818_p3 = scmp.lt.u32.totalorder %s3814_s29, %s4555_s0 }
  0x29   :  { %p3820_p4 = pnand %p3818_p3, %p3815_p2 }
  0x2b   :  { %3823 = shalt.err (!%p3820_p4)
}
  0x2c   :  { %s3824_s16 = scalar_lea.vmem %s26_s26, 256  ;;  %p3829_p6 = scmp.lt.s32.totalorder %s26_s26, %s26_s26 }
  0x2d   :  { %p3825_p5 = scmp.ne.s32.totalorder %s26_s26, %s3824_s16  ;;  %p3830_p7 = scmp.lt.s32.totalorder %s3824_s16, %s3824_s16 }
  0x2f   :  { %p3831_p8 = por %p3830_p7, %p3829_p6 }
  0x31   :  { %p3832_p9 = pnand %p3831_p8, %p3825_p5 }
  0x33   :  { %3835 = shalt.err (!%p3832_p9)
}
  0x34   :  { %s3917_s5 = smov 32   ;;  %s3918_s13 = smov 2  }
  0x35   :  { %31 = dma.hbm_to_vmem [thread:$0]  %s4555_s0, 256, %s26_s26, [#allocation3], %s3917_s5, %s3917_s5, %s3918_s13  }
  0x36   :  { %s3919_s20 = smov [#allocation7]   ;;  %s3836_s23 = scalar_lea.hbm %s4558_s3, 2048 }
  0x37   :  { %s51_s21 = sshll.u32 %s3919_s20, 4  ;;  %p3837_p10 = scmp.ne.s32.totalorder %s4558_s3, %s3836_s23  ;;  %s52_s21 = int_to_ptr.vmem [resolvable:$true] %s51_s21 }
  0x38   :  { %p3840_p11 = scmp.lt.u32.totalorder %s3836_s23, %s4558_s3 }
  0x3a   :  { %p3842_p12 = pnand %p3840_p11, %p3837_p10 }
  0x3c   :  { %3845 = shalt.err (!%p3842_p12)
}
  0x3d   :  { %s3846_s29 = scalar_lea.vmem %s52_s21, 2048  ;;  %p3851_p0 = scmp.lt.s32.totalorder %s52_s21, %s52_s21 }
  0x3e   :  { %p3847_p13 = scmp.ne.s32.totalorder %s52_s21, %s3846_s29  ;;  %p3852_p1 = scmp.lt.s32.totalorder %s3846_s29, %s3846_s29 }
  0x40   :  { %p3853_p2 = por %p3852_p1, %p3851_p0 }
  0x42   :  { %p3854_p3 = pnand %p3853_p2, %p3847_p13 }
  0x44   :  { %3857 = shalt.err (!%p3854_p3)
}
  0x45   :  { %s3920_s0 = smov 128   ;;  %s3921_s26 = smov 8  }
  0x46   :  { %57 = dma.hbm_to_vmem [thread:$0]  %s4558_s3, 2048, %s52_s21, [#allocation6], %s3920_s0, %s3920_s0, %s3921_s26  }
  0x47   :  { %s3922_s14 = smov [#allocation10]   ;;  %s3858_s19 = scalar_lea.hbm %s4562_s7, 4096 }
  0x48   :  { %s79_s15 = sshll.u32 %s3922_s14, 4  ;;  %p3859_p4 = scmp.ne.s32.totalorder %s4562_s7, %s3858_s19  ;;  %s80_s15 = int_to_ptr.vmem [resolvable:$true] %s79_s15 }
  0x49   :  { %p3862_p5 = scmp.lt.u32.totalorder %s3858_s19, %s4562_s7 }
  0x4b   :  { %p3864_p6 = pnand %p3862_p5, %p3859_p4 }
  0x4d   :  { %3867 = shalt.err (!%p3864_p6)
}
  0x4e   :  { %s3868_s24 = scalar_lea.vmem %s80_s15, 4096  ;;  %p3873_p8 = scmp.lt.s32.totalorder %s80_s15, %s80_s15 }
  0x4f   :  { %p3869_p7 = scmp.ne.s32.totalorder %s80_s15, %s3868_s24  ;;  %p3874_p9 = scmp.lt.s32.totalorder %s3868_s24, %s3868_s24 }
  0x51   :  { %p3875_p10 = por %p3874_p9, %p3873_p8 }
  0x53   :  { %p3876_p11 = pnand %p3875_p10, %p3869_p7 }
  0x55   :  { %3879 = shalt.err (!%p3876_p11)
}
  0x56   :  { %85 = dma.hbm_to_vmem [thread:$0]  %s4562_s7, 4096, %s80_s15, [#allocation9], %s3920_s0, %s3920_s0, %s3921_s26  }
  0x57   :  { %3902 = dma.done.wait [#allocation3], 256  }
  0x58   :  { %3903 = vsyncadd [#allocation3], 4294967040 }
  0x59   :  { %3904 = dma.done.wait [#allocation6], 8192  }
  0x5a   :  { %3905 = vsyncadd [#allocation6], 4294959104 }
  0x5b   :  { %3906 = dma.done.wait [#allocation9], 8192  }
  0x5c   :  { %3907 = vsyncadd [#allocation9], 4294959104  ;;  %v137_v0 = vlaneseq  ;;  %v3923_v1 = vmov 1983009808   ;;  %v4063_v5 = vld [vmem:[#allocation2] sm:$0x3] }
  0x5d   :  { %v135_v2 = vunpack.c.l.s4 %v3923_v1  ;;  %v4065_v6 = vld [vmem:[#allocation2 + $0x2] sm:$0x3]  ;;  %v4067_v7 = vld [vmem:[#allocation2 + $0x4] sm:$0x3]  ;;  %v4069_v8 = vld [vmem:[#allocation2 + $0x6] sm:$0x3]  ;;  %v116_v9 = vmul.f32 %v4063_v5, %v4063_v5 }
  0x5e   :  { %v4061_v4 = vshrl.u32 %v137_v0, 7  ;;  %v117_v10 = vmul.f32 %v4065_v6, %v4065_v6  ;;  %v118_v11 = vmul.f32 %v4067_v7, %v4067_v7  ;;  %v4080_v13 = vld [vmem:[#allocation2 + $0x8] sm:$0x3]  ;;  %v4082_v14 = vld [vmem:[#allocation2 + $0xa] sm:$0x3]  ;;  %v119_v15 = vmul.f32 %v4069_v8, %v4069_v8  ;;  %v288_v20 = vld [vmem:[#allocation5 + $0x8] sm:$0xff] }
  0x5f   :  { %v136_v3 = vunpack.c.0.s8 %v135_v2  ;;  %v4086_v16 = vld [vmem:[#allocation2 + $0xc] sm:$0x3]  ;;  %v4088_v17 = vld [vmem:[#allocation2 + $0xe] sm:$0x3]  ;;  %v120_v18 = vmul.f32 %v4080_v13, %v4080_v13  ;;  %v121_v19 = vmul.f32 %v4082_v14, %v4082_v14  ;;  %v291_v24 = vld [vmem:[#allocation5 + $0x20] sm:$0xff]  ;;  %vm699_vm0 = vcmask 130048  }
  0x60   :  { %v132_v21 = vcombine.low %v116_v9, %v117_v10  ;;  %v122_v22 = vmul.f32 %v4086_v16, %v4086_v16  ;;  %v123_v23 = vmul.f32 %v4088_v17, %v4088_v17  ;;  %v287_v25 = vld [vmem:[#allocation5] sm:$0xff]  ;;  %v290_v26 = vld [vmem:[#allocation5 + $0x18] sm:$0xff]  ;;  %v133_v27 = vcombine.low %v118_v11, %v119_v15  ;;  %v297_v32 = vld [vmem:[#allocation5 + $0x50] sm:$0xff]  ;;  %s3929_s28 = smov 96   ;;  %s3931_s29 = smov 80  }
  0x61   :  { %v4078_v12 = vsub.s32 %v136_v3, %v4061_v4  ;;  %v149_v28 = vcombine.low %v120_v18, %v121_v19  ;;  %v3319_v29 = vpack.c.bf16 %v291_v24, %v288_v20  ;;  %v3321_v30 = vpack.c.bf16 %v290_v26, %v287_v25  ;;  %v294_v31 = vld [vmem:[#allocation5 + $0x38] sm:$0xff]  ;;  %v289_v33 = vld [vmem:[#allocation5 + $0x10] sm:$0xff]  ;;  %v292_v37 = vld [vmem:[#allocation5 + $0x28] sm:$0xff]  ;;  %s3932_s0 = smov 64   ;;  %s3933_s26 = smov 48  }
  0x62   :  { %v150_v35 = vcombine.low %v122_v22, %v123_v23  ;;  %v3323_v36 = vpack.c.bf16 %v297_v32, %v294_v31  ;;  %v3351_v40 = vpack.c.bf16 %v292_v37, %v289_v33  ;;  %v293_v44 = vld [vmem:[#allocation5 + $0x30] sm:$0xff]  ;;  %v296_v45 = vld [vmem:[#allocation5 + $0x48] sm:$0xff]  ;;  %v303_v48 = vld [vmem:[#allocation5 + $0x80] sm:$0xff]  ;;  %v3924_v19 = vmov 0.0  }
  0x63   :  { %v140_v34 = vrot.slane %v132_v21, %v4078_v12  ;;  %v147_v38 = vrot.slane %v133_v27, %v4078_v12  ;;  %v157_v39 = vrot.slane %v149_v28, %v4078_v12  ;;  %3320 = vmatprep.subr.bf16.mxu0 %v3319_v29  ;;  %v3325_v46 = vpack.c.bf16 %v296_v45, %v293_v44  ;;  %v300_v47 = vld [vmem:[#allocation5 + $0x68] sm:$0xff]  ;;  %v295_v49 = vld [vmem:[#allocation5 + $0x40] sm:$0xff]  ;;  %v298_v51 = vld [vmem:[#allocation5 + $0x58] sm:$0xff] }
  0x64   :  { %v164_v41 = vrot.slane %v150_v35, %v4078_v12  ;;  %3322 = vmatpush1.bf16.msra.mxu0 %v3321_v30  ;;  %3352 = vmatprep.subr.bf16.mxu1 %v3351_v40  ;;  %v3327_v50 = vpack.c.bf16 %v303_v48, %v300_v47  ;;  %v299_v52 = vld [vmem:[#allocation5 + $0x60] sm:$0xff]  ;;  %v302_v53 = vld [vmem:[#allocation5 + $0x78] sm:$0xff]  ;;  %v3355_v54 = vpack.c.bf16 %v298_v51, %v295_v49  ;;  %v309_v57 = vld [vmem:[#allocation5 + $0xb0] sm:$0xff]  ;;  %vm2246_vm4 = vcmask 261120  }
  0x65   :  { %v148_v42 = vcombine.low %v140_v34, %v147_v38  ;;  %3324 = vmatprep.subr.bf16.mxu0 %v3323_v36  ;;  %3354 = vmatpush3.bf16.msra.mxu1 %v3351_v40  ;;  %v3329_v55 = vpack.c.bf16 %v302_v53, %v299_v52  ;;  %v306_v56 = vld [vmem:[#allocation5 + $0x98] sm:$0xff]  ;;  %v301_v58 = vld [vmem:[#allocation5 + $0x70] sm:$0xff]  ;;  %v304_v60 = vld [vmem:[#allocation5 + $0x88] sm:$0xff]  ;;  %vm2249_vm5 = vcmask 392192   ;;  %vm2252_vm6 = vcmask 523264  }
  0x66   :  { %v165_v43 = vcombine.low %v157_v39, %v164_v41  ;;  %3356 = vmatprep.subr.bf16.mxu1 %v3355_v54  ;;  %v3331_v59 = vpack.c.bf16 %v309_v57, %v306_v56  ;;  %v305_v61 = vld [vmem:[#allocation5 + $0x90] sm:$0xff]  ;;  %v308_v62 = vld [vmem:[#allocation5 + $0xa8] sm:$0xff]  ;;  %v3359_v63 = vpack.c.bf16 %v304_v60, %v301_v58  ;;  %v315_v3 = vld [vmem:[#allocation5 + $0xe0] sm:$0xff]  ;;  %460 = vmatprep.mubr.f32.mxu0 %v3924_v19  ;;  %v3925_v57 = vmov 269488144  }
  0x67   :  { %168 = vadd.xlane.f32.xlu0 %v148_v42  ;;  %v3333_v1 = vpack.c.bf16 %v308_v62, %v305_v61  ;;  %v312_v2 = vld [vmem:[#allocation5 + $0xc8] sm:$0xff]  ;;  %v307_v9 = vld [vmem:[#allocation5 + $0xa0] sm:$0xff]  ;;  %v310_v11 = vld [vmem:[#allocation5 + $0xb8] sm:$0xff]  ;;  %v182_v58 = vunpack.c.l.s4 %v3925_v57  ;;  %v3927_v61 = vmov 1414812756   ;;  %vm2255_vm7 = vcmask 654336  }
  0x68   :  { %3326 = vmatpush1.bf16.msra.mxu0 %v3325_v46  ;;  %v3335_v10 = vpack.c.bf16 %v315_v3, %v312_v2  ;;  %v311_v15 = vld [vmem:[#allocation5 + $0xc0] sm:$0xff]  ;;  %v314_v18 = vld [vmem:[#allocation5 + $0xd8] sm:$0xff]  ;;  %v3363_v20 = vpack.c.bf16 %v310_v11, %v307_v9  ;;  %v321_v23 = vld [vmem:[#allocation5 + $0x110] sm:$0xff]  ;;  %v196_v62 = vunpack.c.l.s4 %v3927_v61  ;;  %vm2258_vm8 = vcmask 785408  }
  0x69   :  { %3328 = vmatprep.subr.bf16.mxu0 %v3327_v50  ;;  %3358 = vmatpush3.bf16.msra.mxu1 %v3355_v54  ;;  %v3337_v21 = vpack.c.bf16 %v314_v18, %v311_v15  ;;  %v318_v22 = vld [vmem:[#allocation5 + $0xf8] sm:$0xff]  ;;  %v313_v24 = vld [vmem:[#allocation5 + $0xd0] sm:$0xff]  ;;  %v316_v26 = vld [vmem:[#allocation5 + $0xe8] sm:$0xff]  ;;  %vm2261_vm9 = vcmask 916480  }
  0x6a   :  { %3360 = vmatprep.subr.bf16.mxu1 %v3359_v63  ;;  %v3339_v25 = vpack.c.bf16 %v321_v23, %v318_v22  ;;  %v317_v27 = vld [vmem:[#allocation5 + $0xf0] sm:$0xff]  ;;  %v320_v28 = vld [vmem:[#allocation5 + $0x108] sm:$0xff]  ;;  %v3367_v29 = vpack.c.bf16 %v316_v26, %v313_v24  ;;  %v327_v32 = vld [vmem:[#allocation5 + $0x140] sm:$0xff]  ;;  %v197_v15 = vunpack.c.0.s8 %v196_v62 }
  0x6b   :  { %170 = vadd.xlane.f32.xlu0 %v165_v43  ;;  %v3341_v30 = vpack.c.bf16 %v320_v28, %v317_v27  ;;  %v324_v31 = vld [vmem:[#allocation5 + $0x128] sm:$0xff]  ;;  %v319_v33 = vld [vmem:[#allocation5 + $0x100] sm:$0xff]  ;;  %v322_v35 = vld [vmem:[#allocation5 + $0x118] sm:$0xff] }
  0x6c   :  { %3330 = vmatpush1.bf16.msra.mxu0 %v3329_v55  ;;  %v3343_v34 = vpack.c.bf16 %v327_v32, %v324_v31  ;;  %v323_v36 = vld [vmem:[#allocation5 + $0x120] sm:$0xff]  ;;  %v326_v37 = vld [vmem:[#allocation5 + $0x138] sm:$0xff]  ;;  %v3371_v38 = vpack.c.bf16 %v322_v35, %v319_v33  ;;  %v333_v40 = vld [vmem:[#allocation5 + $0x170] sm:$0xff]  ;;  %v4115_v24 = vsub.s32 %v197_v15, %v4061_v4 }
  0x6d   :  { %3332 = vmatprep.subr.bf16.mxu0 %v3331_v59  ;;  %3362 = vmatpush3.bf16.msra.mxu1 %v3359_v63  ;;  %v330_v39 = vld [vmem:[#allocation5 + $0x158] sm:$0xff]  ;;  %v325_v41 = vld [vmem:[#allocation5 + $0x130] sm:$0xff]  ;;  %v328_v42 = vld [vmem:[#allocation5 + $0x148] sm:$0xff]  ;;  %v3345_v43 = vpack.c.bf16 %v326_v37, %v323_v36  ;;  %v3926_v59 = vmov 842150450  }
  0x6e   :  { %3364 = vmatprep.subr.bf16.mxu1 %v3363_v20  ;;  %v3347_v44 = vpack.c.bf16 %v333_v40, %v330_v39  ;;  %v329_v45 = vld [vmem:[#allocation5 + $0x150] sm:$0xff]  ;;  %v332_v46 = vld [vmem:[#allocation5 + $0x168] sm:$0xff]  ;;  %v3375_v47 = vpack.c.bf16 %v328_v42, %v325_v41  ;;  %v331_v49 = vld [vmem:[#allocation5 + $0x160] sm:$0xff]  ;;  %v189_v60 = vunpack.c.l.s4 %v3926_v59  ;;  %v3928_v63 = vmov 1987475062  }
  0x6f   :  { %v3349_v48 = vpack.c.bf16 %v332_v46, %v329_v45  ;;  %v334_v50 = vld [vmem:[#allocation5 + $0x178] sm:$0xff]  ;;  %v2947_v56 = vld [vmem:[%s4564_s9] ss:$0 sm:$0xff]  ;;  %v347_v59 = vsub.s32 2, %v4061_v4  ;;  %vm4156_vm1 = vmpackc.low %vm699_vm0, %vm699_vm0 }
  0x70   :  { %3334 = vmatpush1.bf16.msra.mxu0 %v3333_v1  ;;  %v3379_v51 = vpack.c.bf16 %v334_v50, %v331_v49  ;;  %v203_v1 = vunpack.c.l.s4 %v3928_v63  ;;  %v258_v9 = vcombine.high %v2947_v56, %v2947_v56  ;;  %v190_v11 = vunpack.c.0.s8 %v189_v60  ;;  %v335_v57 = vld [vmem:[%s4557_s2] sm:$0x7]  ;;  %s3930_s2 = smov 112  }
  0x71   :  { %3336 = vmatprep.subr.bf16.mxu0 %v3335_v10  ;;  %3366 = vmatpush3.bf16.msra.mxu1 %v3363_v20  ;;  %v183_v10 = vunpack.c.0.s8 %v182_v58  ;;  %v265_v20 = vrot.slane %v2947_v56, %v4078_v12  ;;  %v343_v60 = vsub.s32 1, %v4061_v4 }
  0x72   :  { %3368 = vmatprep.subr.bf16.mxu1 %v3367_v29  ;;  %v204_v18 = vunpack.c.0.s8 %v203_v1  ;;  %v4112_v23 = vsub.s32 %v190_v11, %v4061_v4  ;;  %v348_v1 = vrot.slane %v335_v57, %v347_v59 }
  0x73   :  { %v4109_v22 = vsub.s32 %v183_v10, %v4061_v4  ;;  %v273_v27 = vcombine.high %v265_v20, %v265_v20 }
  0x74   :  { %3338 = vmatpush1.bf16.msra.mxu0 %v3337_v21  ;;  %v272_v21 = vrot.slane %v258_v9, %v4078_v12 }
  0x75   :  { %3340 = vmatprep.subr.bf16.mxu0 %v3339_v25  ;;  %3370 = vmatpush3.bf16.msra.mxu1 %v3367_v29  ;;  %v4118_v25 = vsub.s32 %v204_v18, %v4061_v4 }
  0x76   :  { %3372 = vmatprep.subr.bf16.mxu1 %v3371_v38  ;;  %v274_v28 = vcombine.high %v272_v21, %v272_v21 }
  0x78   :  { %3342 = vmatpush1.bf16.msra.mxu0 %v3341_v30 }
  0x79   :  { %3344 = vmatprep.subr.bf16.mxu0 %v3343_v34  ;;  %3374 = vmatpush3.bf16.msra.mxu1 %v3371_v38 }
  0x7a   :  { %3376 = vmatprep.subr.bf16.mxu1 %v3375_v47 }
  0x7c   :  { %3346 = vmatpush1.bf16.msra.mxu0 %v3345_v43 }
  0x7d   :  { %3348 = vmatprep.subr.bf16.mxu0 %v3347_v44  ;;  %3378 = vmatpush3.bf16.msra.mxu1 %v3375_v47 }
  0x7e   :  { %3380 = vmatprep.subr.bf16.mxu1 %v3379_v51 }
  0x80   :  { %3350 = vmatpush1.bf16.msra.mxu0 %v3349_v48 }
  0x81   :  { %3382 = vmatpush3.bf16.msra.mxu1 %v3379_v51 }
  0xf4   :  { %v169_v52 = vpop.xlane.xlu0 %168 }
  0xf5   :  { %v173_v53 = vmul.f32 0.0078125, %v169_v52 }
  0xf7   :  { %v175_v54 = vadd.f32 1e-06, %v173_v53 }
  0xf8   :  { %v171_v55 = vpop.xlane.xlu0 %170 }
  0xf9   :  { %3690 = vrsqrt.f32 %v175_v54  ;;  %v174_v2 = vmul.f32 0.0078125, %v171_v55 }
  0xfb   :  { %v176_v3 = vadd.f32 1e-06, %v174_v2 }
  0xfd   :  { %3692 = vrsqrt.f32 %v176_v3  ;;  %v344_v3 = vrot.slane %v335_v57, %v343_v60 }
 0x103   :  { %v3691_v26 = vpop.eup %3690 }
 0x104   :  { %v187_v29 = vrot.slane %v3691_v26, %v4109_v22  ;;  %v194_v30 = vrot.slane %v3691_v26, %v4112_v23  ;;  %v201_v31 = vrot.slane %v3691_v26, %v4115_v24  ;;  %v208_v32 = vrot.slane %v3691_v26, %v4118_v25 }
 0x106   :  { %v245_v33 = vmul.f32 %v187_v29, %v4063_v5  ;;  %v246_v34 = vmul.f32 %v194_v30, %v4065_v6  ;;  %v247_v35 = vmul.f32 %v201_v31, %v4067_v7  ;;  %v248_v36 = vmul.f32 %v208_v32, %v4069_v8 }
 0x107   :  { %v3693_v37 = vpop.eup %3692 }
 0x108   :  { %v279_v38 = vmul.f32 %v265_v20, %v245_v33  ;;  %v280_v39 = vmul.f32 %v273_v27, %v246_v34  ;;  %v281_v40 = vmul.f32 %v272_v21, %v247_v35  ;;  %v282_v41 = vmul.f32 %v274_v28, %v248_v36 }
 0x109   :  { %v215_v42 = vrot.slane %v3693_v37, %v4109_v22  ;;  %v222_v43 = vrot.slane %v3693_v37, %v4112_v23  ;;  %v229_v44 = vrot.slane %v3693_v37, %v4115_v24  ;;  %v236_v45 = vrot.slane %v3693_v37, %v4118_v25 }
 0x10a   :  { %v360_v5 = vcombine.low %v279_v38, %v280_v39  ;;  %v361_v46 = vcombine.low %v281_v40, %v282_v41 }
 0x10b   :  { %v249_v6 = vmul.f32 %v215_v42, %v4080_v13  ;;  %v250_v7 = vmul.f32 %v222_v43, %v4082_v14  ;;  %v251_v8 = vmul.f32 %v229_v44, %v4086_v16  ;;  %v252_v47 = vmul.f32 %v236_v45, %v4088_v17 }
 0x10c   :  { %v368_v48 = vrot.slane %v360_v5, %v4078_v12  ;;  %v375_v49 = vrot.slane %v361_v46, %v4078_v12  ;;  %v339_v17 = vsub.s32 0, %v4061_v4 }
 0x10d   :  { %v283_v50 = vmul.f32 %v265_v20, %v249_v6  ;;  %v284_v51 = vmul.f32 %v273_v27, %v250_v7  ;;  %v285_v52 = vmul.f32 %v272_v21, %v251_v8  ;;  %v286_v53 = vmul.f32 %v274_v28, %v252_v47 }
 0x10e   :  { %v376_v54 = vcombine.low %v368_v48, %v375_v49  ;;  %v340_v58 = vrot.slane %v335_v57, %v339_v17 }
 0x10f   :  { %v377_v55 = vcombine.low %v283_v50, %v284_v51  ;;  %v378_v56 = vcombine.low %v285_v52, %v286_v53 }
 0x110   :  { %461 = vmatmul.mubr.f32.vlgmr.msra.gmra.mrb[0].mxu0 %v376_v54  ;;  %3169 = vmatprep.mubr.f32.mxu1 %v376_v54 }
 0x111   :  { %466 = vmatprep.mubr.f32.mxu0 %v3924_v19  ;;  %v385_v13 = vrot.slane %v377_v55, %v4078_v12  ;;  %v392_v14 = vrot.slane %v378_v56, %v4078_v12 }
 0x113   :  { %v393_v16 = vcombine.low %v385_v13, %v392_v14 }
 0x115   :  { %467 = vmatmul.mubr.f32.gmra.mrb[2].mxu0 %v393_v16  ;;  %3170 = vmatmul.mubr.f32.vlgmr.msra.gmra.mrb[0].mxu1 %v393_v16 }
 0x1e3   :  { %v462_v61 = vpop.f32.mrb[0].mxu0 }
 0x1e4   :  { %v463_v62 = vadd.f32 %v462_v61, %v340_v58  ;;  %v464_v63 = vpop.f32.mrb[1].mxu0 }
 0x1e5   :  { %v465_v20 = vadd.f32 %v464_v63, %v344_v3 }
 0x1e6   :  { %v548_v2 = vmul.f32 0.25, %v463_v62 }
 0x1e8   :  { %v468_v9 = vpop.f32.mrb[2].mxu0  ;;  %v3171_v10 = vpop.f32.mrb[0].mxu1  ;;  %556 = vrot.lane.b32.xlu1 %v548_v2, %s3929_s28  ;;  %552 = vrot.lane.b32.xlu0 %v548_v2, %s3930_s2 }
 0x1e9   :  { %v545_v11 = vadd.f32 %v3171_v10, %v348_v1  ;;  %v470_v15 = vpop.f32.mrb[3].mxu0  ;;  %v539_v18 = vpop.f32.mrb[1].mxu1  ;;  %3176 = vmatprep.mubr.msk.f32.mxu1 %vm699_vm0, %v548_v2  ;;  %v469_v32 = vadd.f32 %v468_v9, %v340_v58 }
 0x1ea   :  { %v471_v21 = vadd.f32 %v470_v15, %v344_v3  ;;  %v540_v26 = vadd.f32 %v539_v18, %v348_v1 }
 0x1eb   :  { %v549_v33 = vmul.f32 0.25, %v469_v32 }
 0x1ec   :  { %560 = vrot.lane.b32.xlu0 %v548_v2, %s3931_s29  ;;  %v3585_v28 = vpack.i.bf16 %v471_v21, %v465_v20  ;;  %v3383_v29 = vpack.c.bf16 %v471_v21, %v465_v20  ;;  %v4161_v30 = vpack.i.bf16 %v545_v11, %v540_v26  ;;  %v4168_v31 = vpack.c.bf16 %v545_v11, %v540_v26 }
 0x1ee   :  { %3586 = vrot.lane.b32.xlu1 %v3585_v28, %s3930_s2  ;;  %3385 = vmatprep.subr.msk.bf16.mxu1 %vm4156_vm1, %v3383_v29 }
 0x1ef   :  { %3388 = vmatpush3.bf16.xpose.msk.msra.mxu1 %vm4156_vm1, %v3383_v29 }
 0x1f0   :  { %3611 = vrot.lane.b32.xlu0 %v3585_v28, %s3917_s5 }
 0x1f2   :  { %3591 = vrot.lane.b32.xlu1 %v3585_v28, %s3929_s28 }
 0x1f4   :  { %564 = vrot.lane.b32.xlu0 %v548_v2, %s3932_s0 }
 0x1f6   :  { %3596 = vrot.lane.b32.xlu1 %v3585_v28, %s3931_s29  ;;  %3177 = vmatmul.mubr.msk.f32.vlgmr.msra.gmra.mrb[2].mxu1 %vm699_vm0, %v549_v33 }
 0x1f8   :  { %568 = vrot.lane.b32.xlu0 %v548_v2, %s3933_s26 }
 0x1fa   :  { %3601 = vrot.lane.b32.xlu1 %v3585_v28, %s3932_s0 }
 0x1fc   :  { %572 = vrot.lane.b32.xlu0 %v548_v2, %s3917_s5 }
 0x1fe   :  { %554 = vrot.lane.b32.xlu1 %v549_v33, %s3930_s2 }
 0x200   :  { %576 = vrot.lane.b32.xlu0 %v548_v2, %s3915_s18 }
 0x202   :  { %3606 = vrot.lane.b32.xlu1 %v3585_v28, %s3933_s26 }
 0x204   :  { %3626 = vrot.lane.b32.xlu0 %v4161_v30, %s3929_s28 }
 0x206   :  { %558 = vrot.lane.b32.xlu1 %v549_v33, %s3929_s28 }
 0x20a   :  { %3616 = vrot.lane.b32.xlu1 %v3585_v28, %s3915_s18 }
 0x20e   :  { %562 = vrot.lane.b32.xlu1 %v549_v33, %s3931_s29 }
 0x212   :  { %566 = vrot.lane.b32.xlu1 %v549_v33, %s3932_s0 }
 0x216   :  { %570 = vrot.lane.b32.xlu1 %v549_v33, %s3933_s26 }
 0x21a   :  { %574 = vrot.lane.b32.xlu1 %v549_v33, %s3917_s5 }
 0x21e   :  { %578 = vrot.lane.b32.xlu1 %v549_v33, %s3915_s18 }
 0x222   :  { %3621 = vrot.lane.b32.xlu1 %v4161_v30, %s3930_s2 }
 0x226   :  { %3631 = vrot.lane.b32.xlu1 %v4161_v30, %s3931_s29 }
 0x25a   :  { %v557_v34 = vpop.permute.xlu1 %556  ;;  %v553_v35 = vpop.permute.xlu0 %552 }
 0x25b   :  { %3183 = vmatprep.mubr.msk.f32.mxu1 %vm699_vm0, %v553_v35 }
 0x25e   :  { %v561_v36 = vpop.permute.xlu0 %560 }
 0x260   :  { %v3587_v37 = vpop.permute.xlu1 %3586 }
 0x261   :  { %v3589_v38 = vunpack.i.h.bf16 %v3587_v37  ;;  %v3588_v39 = vunpack.i.l.bf16 %v3587_v37 }
 0x262   :  { %v3612_v40 = vpop.permute.xlu0 %3611 }
 0x263   :  { %v3389_v41 = vpack.c.bf16 %v3589_v38, %v3588_v39  ;;  %v3614_v49 = vunpack.i.h.bf16 %v3612_v40  ;;  %v3613_v50 = vunpack.i.l.bf16 %v3612_v40  ;;  %v663_v39 = vand.u32 1, %v4061_v4 }
 0x264   :  { %v3592_v42 = vpop.permute.xlu1 %3591  ;;  %v3934_v40 = vmov -1e+30  }
 0x265   :  { %v3594_v43 = vunpack.i.h.bf16 %v3592_v42  ;;  %v3593_v44 = vunpack.i.l.bf16 %v3592_v42  ;;  %3391 = vmatprep.subr.msk.bf16.mxu1 %vm4156_vm1, %v3389_v41  ;;  %v3419_v54 = vpack.c.bf16 %v3614_v49, %v3613_v50 }
 0x266   :  { %3394 = vmatpush3.bf16.xpose.msk.msra.mxu1 %vm4156_vm1, %v3389_v41  ;;  %v565_v45 = vpop.permute.xlu0 %564 }
 0x267   :  { %v3395_v5 = vpack.c.bf16 %v3594_v43, %v3593_v44  ;;  %3204 = vmatprep.mubr.msk.f32.mxu0 %vm699_vm0, %v565_v45 }
 0x268   :  { %v3597_v46 = vpop.permute.xlu1 %3596 }
 0x269   :  { %3397 = vmatprep.subr.msk.bf16.mxu1 %vm4156_vm1, %v3395_v5  ;;  %v3599_v7 = vunpack.i.h.bf16 %v3597_v46  ;;  %v3598_v8 = vunpack.i.l.bf16 %v3597_v46 }
 0x26a   :  { %v569_v55 = vpop.permute.xlu0 %568 }
 0x26b   :  { %v3401_v53 = vpack.c.bf16 %v3599_v7, %v3598_v8 }
 0x26c   :  { %v3602_v6 = vpop.permute.xlu1 %3601 }
 0x26d   :  { %v3604_v47 = vunpack.i.h.bf16 %v3602_v6  ;;  %v3603_v48 = vunpack.i.l.bf16 %v3602_v6 }
 0x26e   :  { %v573_v58 = vpop.permute.xlu0 %572 }
 0x26f   :  { %v3407_v51 = vpack.c.bf16 %v3604_v47, %v3603_v48 }
 0x270   :  { %v555_v52 = vpop.permute.xlu1 %554 }
 0x271   :  { %3184 = vmatmul.mubr.msk.f32.vlgmr.msra.gmra.mrb[4].mxu1 %vm699_vm0, %v555_v52  ;;  %3409 = vmatprep.subr.msk.bf16.mxu0 %vm4156_vm1, %v3407_v51 }
 0x272   :  { %3400 = vmatpush3.bf16.xpose.msk.msra.mxu1 %vm4156_vm1, %v3395_v5  ;;  %3190 = vmatprep.mubr.msk.f32.mxu1 %vm699_vm0, %v557_v34  ;;  %v577_v1 = vpop.permute.xlu0 %576 }
 0x273   :  { %3403 = vmatprep.subr.msk.bf16.mxu1 %vm4156_vm1, %v3401_v53  ;;  %3412 = vmatpush3.bf16.xpose.msk.msra.mxu0 %vm4156_vm1, %v3407_v51 }
 0x274   :  { %3421 = vmatprep.subr.msk.bf16.mxu0 %vm4156_vm1, %v3419_v54  ;;  %v3607_v56 = vpop.permute.xlu1 %3606 }
 0x275   :  { %v3609_v13 = vunpack.i.h.bf16 %v3607_v56  ;;  %v3608_v14 = vunpack.i.l.bf16 %v3607_v56 }
 0x276   :  { %v3627_v9 = vpop.permute.xlu0 %3626 }
 0x277   :  { %v3413_v16 = vpack.c.bf16 %v3609_v13, %v3608_v14  ;;  %v3629_v11 = vunpack.i.h.bf16 %v3627_v9  ;;  %v3628_v15 = vunpack.i.l.bf16 %v3627_v9 }
 0x278   :  { %v559_v57 = vpop.permute.xlu1 %558 }
 0x279   :  { %3191 = vmatmul.mubr.msk.f32.vlgmr.msra.gmra.mrb[6].mxu1 %vm699_vm0, %v559_v57  ;;  %v4235_v20 = vpack.c.bf16 %v3629_v11, %v3628_v15 }
 0x27a   :  { %3406 = vmatpush3.bf16.xpose.msk.msra.mxu1 %vm4156_vm1, %v3401_v53  ;;  %3197 = vmatprep.mubr.msk.f32.mxu1 %vm699_vm0, %v561_v36  ;;  %v658_v36 = vand.u32 127, %v137_v0 }
 0x27b   :  { %3415 = vmatprep.subr.msk.bf16.mxu1 %vm4156_vm1, %v3413_v16 }
 0x27c   :  { %v3617_v59 = vpop.permute.xlu1 %3616  ;;  %v687_v38 = vand.u32 1, %v658_v36 }
 0x27d   :  { %v3619_v61 = vunpack.i.h.bf16 %v3617_v59  ;;  %v3618_v62 = vunpack.i.l.bf16 %v3617_v59 }
 0x27e   :  { %vm695_vm3 = vcmp.eq.s32.totalorder %v663_v39, %v687_v38 }
 0x27f   :  { %v3425_v63 = vpack.c.bf16 %v3619_v61, %v3618_v62  ;;  %v697_v42 = vsel %vm695_vm3, 0.0, %v3934_v40 }
 0x280   :  { %v563_v2 = vpop.permute.xlu1 %562 }
 0x281   :  { %3198 = vmatmul.mubr.msk.f32.vlgmr.msra.gmra.mrb[8].mxu1 %vm699_vm0, %v563_v2 }
 0x282   :  { %3418 = vmatpush3.bf16.xpose.msk.msra.mxu1 %vm4156_vm1, %v3413_v16  ;;  %3211 = vmatprep.mubr.msk.f32.mxu1 %vm699_vm0, %v569_v55 }
 0x283   :  { %3427 = vmatprep.subr.msk.bf16.mxu1 %vm4156_vm1, %v3425_v63 }
 0x284   :  { %v567_v3 = vpop.permute.xlu1 %566 }
 0x285   :  { %3205 = vmatmul.mubr.msk.f32.vlgmr.msra.gmra.mrb[4].mxu0 %vm699_vm0, %v567_v3 }
 0x286   :  { %3424 = vmatpush3.bf16.xpose.msk.msra.mxu0 %vm4156_vm1, %v3419_v54  ;;  %3218 = vmatprep.mubr.msk.f32.mxu0 %vm699_vm0, %v573_v58 }
 0x287   :  { %3432 = vmatprep.subr.bf16.mxu0 %v4168_v31 }
 0x288   :  { %v571_v10 = vpop.permute.xlu1 %570 }
 0x289   :  { %3212 = vmatmul.mubr.msk.f32.vlgmr.msra.gmra.mrb[10].mxu1 %vm699_vm0, %v571_v10 }
 0x28a   :  { %3430 = vmatpush3.bf16.xpose.msk.msra.mxu1 %vm4156_vm1, %v3425_v63  ;;  %3225 = vmatprep.mubr.msk.f32.mxu1 %vm699_vm0, %v577_v1 }
 0x28c   :  { %v575_v18 = vpop.permute.xlu1 %574 }
 0x28d   :  { %3219 = vmatmul.mubr.msk.f32.vlgmr.msra.gmra.mrb[6].mxu0 %vm699_vm0, %v575_v18 }
 0x28e   :  { %3434 = vmatpush3.bf16.msra.mxu0 %v4168_v31  ;;  %v656_v31 = vadd.s32 8, %v4061_v4  ;;  %v2998_v4 = vld [vmem:[%s4563_s8] ss:$0 sm:$0xff]  ;;  %s3935_s8 = smov [#allocation11]  }
 0x28f   :  { %3440 = vmatprep.subr.bf16.mxu0 %v4235_v20  ;;  %s2933_s16 = sshll.u32 %s3935_s8, 4  ;;  %s2934_s16 = int_to_ptr.vmem [resolvable:$true] %s2933_s16 }
 0x290   :  { %v579_v21 = vpop.permute.xlu1 %578  ;;  %v670_v37 = vand.u32 1, %v656_v31  ;;  %s3880_s17 = scalar_lea.vmem %s2934_s16, 256  ;;  %p3885_p13 = scmp.lt.s32.totalorder %s2934_s16, %s2934_s16 }
 0x291   :  { %3226 = vmatmul.mubr.msk.f32.vlgmr.msra.gmra.mrb[12].mxu1 %vm699_vm0, %v579_v21  ;;  %p3881_p12 = scmp.ne.s32.totalorder %s2934_s16, %s3880_s17  ;;  %p3886_p0 = scmp.lt.s32.totalorder %s3880_s17, %s3880_s17 }
 0x292   :  { %vm696_vm2 = vcmp.eq.s32.totalorder %v670_v37, %v687_v38 }
 0x293   :  { %v698_v41 = vsel %vm696_vm2, 0.0, %v3934_v40  ;;  %p3887_p1 = por %p3886_p0, %p3885_p13 }
 0x294   :  { %v3622_v26 = vpop.permute.xlu1 %3621 }
 0x295   :  { %v3624_v28 = vunpack.i.h.bf16 %v3622_v26  ;;  %v3623_v29 = vunpack.i.l.bf16 %v3622_v26  ;;  %p3888_p2 = pnand %p3887_p1, %p3881_p12 }
 0x297   :  { %v3435_v32 = vpack.c.bf16 %v3624_v28, %v3623_v29 }
 0x298   :  { %v3632_v27 = vpop.permute.xlu1 %3631 }
 0x299   :  { %v3634_v33 = vunpack.i.h.bf16 %v3632_v27  ;;  %v3633_v34 = vunpack.i.l.bf16 %v3632_v27  ;;  %3436 = vmatprep.subr.bf16.mxu1 %v3435_v32 }
 0x29a   :  { %3438 = vmatpush3.bf16.msra.mxu1 %v3435_v32 }
 0x29b   :  { %v4241_v35 = vpack.c.bf16 %v3634_v33, %v3633_v34 }
 0x29d   :  { %3444 = vmatprep.subr.bf16.mxu1 %v4241_v35 }
 0x2c9   :  { %v3178_v43 = vpop.f32.mrb[2].mxu1 }
 0x2ca   :  { %v4247_v44 = vadd.f32 %v3178_v43, %v698_v41  ;;  %v774_v45 = vpop.f32.mrb[3].mxu1 }
 0x2cb   :  { %v4249_v5 = vadd.f32 %v774_v45, %v697_v42 }
 0x2cc   :  { %v1367_v46 = vsel %vm699_vm0, %v4247_v44, -inf }
 0x2cd   :  { %1368 = vmax.xlane.f32.xlu1 %v1367_v46  ;;  %v1364_v0 = vsel %vm699_vm0, %v4249_v5, -inf }
 0x2ce   :  { %1365 = vmax.xlane.f32.xlu0 %v1364_v0 }
 0x344   :  { %v3185_v6 = vpop.f32.mrb[4].mxu1 }
 0x345   :  { %v4255_v7 = vadd.f32 %v3185_v6, %v698_v41  ;;  %v857_v8 = vpop.f32.mrb[5].mxu1 }
 0x346   :  { %v4263_v56 = vadd.f32 %v857_v8, %v697_v42 }
 0x347   :  { %v1373_v47 = vsel %vm699_vm0, %v4255_v7, -inf }
 0x348   :  { %1374 = vmax.xlane.f32.xlu0 %v1373_v47  ;;  %v1370_v61 = vsel %vm699_vm0, %v4263_v56, -inf }
 0x34c   :  { %v3192_v48 = vpop.f32.mrb[6].mxu1 }
 0x34d   :  { %v940_v49 = vpop.f32.mrb[7].mxu1  ;;  %v4271_v59 = vadd.f32 %v3192_v48, %v698_v41 }
 0x34e   :  { %v4267_v14 = vadd.f32 %v940_v49, %v697_v42 }
 0x34f   :  { %v1379_v9 = vsel %vm699_vm0, %v4271_v59, -inf }
 0x350   :  { %v1376_v63 = vsel %vm699_vm0, %v4267_v14, -inf }
 0x354   :  { %v3199_v50 = vpop.f32.mrb[8].mxu1 }
 0x355   :  { %v1023_v51 = vpop.f32.mrb[9].mxu1  ;;  %v4287_v21 = vadd.f32 %v3199_v50, %v698_v41 }
 0x356   :  { %v4283_v10 = vadd.f32 %v1023_v51, %v697_v42 }
 0x357   :  { %v1385_v27 = vsel %vm699_vm0, %v4287_v21, -inf }
 0x358   :  { %v3206_v52 = vpop.f32.mrb[4].mxu0  ;;  %v1382_v29 = vsel %vm699_vm0, %v4283_v10, -inf }
 0x359   :  { %v4259_v53 = vadd.f32 %v3206_v52, %v698_v41  ;;  %v1106_v54 = vpop.f32.mrb[5].mxu0 }
 0x35a   :  { %v4261_v55 = vadd.f32 %v1106_v54, %v697_v42  ;;  %v1369_v40 = vpop.xlane.xlu1 %1368 }
 0x35b   :  { %v1391_v13 = vsel %vm699_vm0, %v4259_v53, -inf  ;;  %v1366_v39 = vpop.xlane.xlu0 %1365 }
 0x35c   :  { %1392 = vmax.xlane.f32.xlu0 %v1391_v13  ;;  %v3213_v16 = vpop.f32.mrb[10].mxu1  ;;  %v1388_v57 = vsel %vm699_vm0, %v4261_v55, -inf }
 0x35d   :  { %1389 = vmax.xlane.f32.xlu1 %v1388_v57  ;;  %v1189_v58 = vpop.f32.mrb[11].mxu1  ;;  %v4295_v32 = vadd.f32 %v3213_v16, %v698_v41 }
 0x35e   :  { %v4291_v28 = vadd.f32 %v1189_v58, %v697_v42 }
 0x35f   :  { %v1397_v36 = vsel %vm699_vm0, %v4295_v32, -inf }
 0x360   :  { %1371 = vmax.xlane.f32.xlu0 %v1370_v61  ;;  %v3220_v62 = vpop.f32.mrb[6].mxu0  ;;  %v1394_v34 = vsel %vm699_vm0, %v4291_v28, -inf }
 0x361   :  { %1377 = vmax.xlane.f32.xlu1 %v1376_v63  ;;  %v1272_v1 = vpop.f32.mrb[7].mxu0  ;;  %v4279_v3 = vadd.f32 %v3220_v62, %v698_v41 }
 0x362   :  { %v4277_v2 = vadd.f32 %v1272_v1, %v697_v42 }
 0x363   :  { %v1403_v26 = vsel %vm699_vm0, %v4279_v3, -inf }
 0x364   :  { %1380 = vmax.xlane.f32.xlu0 %v1379_v9  ;;  %v3227_v11 = vpop.f32.mrb[12].mxu1  ;;  %v1400_v15 = vsel %vm699_vm0, %v4277_v2, -inf }
 0x365   :  { %v1355_v18 = vpop.f32.mrb[13].mxu1  ;;  %1401 = vmax.xlane.f32.xlu1 %v1400_v15  ;;  %v4303_v31 = vadd.f32 %v3227_v11, %v698_v41  ;;  %v1412_v41 = vsub.f32 %v4249_v5, %v1366_v39 }
 0x366   :  { %v4299_v33 = vadd.f32 %v1355_v18, %v697_v42  ;;  %v1413_v42 = vsub.f32 %v4247_v44, %v1369_v40 }
 0x367   :  { %v1409_v38 = vsel %vm699_vm0, %v4303_v31, -inf  ;;  %v1428_v43 = vmul.f32 1.442695, %v1412_v41 }
 0x368   :  { %1404 = vmax.xlane.f32.xlu0 %v1403_v26  ;;  %v1406_v37 = vsel %vm699_vm0, %v4299_v33, -inf  ;;  %v1430_v45 = vmul.f32 1.442695, %v1413_v42 }
 0x369   :  { %1383 = vmax.xlane.f32.xlu1 %v1382_v29  ;;  %3694 = vpow2.f32 %v1428_v43 }
 0x36a   :  { %3696 = vpow2.f32 %v1430_v45 }
 0x36c   :  { %1386 = vmax.xlane.f32.xlu0 %v1385_v27 }
 0x36d   :  { %1395 = vmax.xlane.f32.xlu1 %v1394_v34 }
 0x370   :  { %1398 = vmax.xlane.f32.xlu0 %v1397_v36 }
 0x371   :  { %1407 = vmax.xlane.f32.xlu1 %v1406_v37 }
 0x373   :  { %v4317_v46 = vpop.eup %3694 }
 0x374   :  { %1410 = vmax.xlane.f32.xlu0 %v1409_v38  ;;  %v4319_v0 = vpop.eup %3696  ;;  %v1460_v6 = vsel %vm699_vm0, %v4317_v46, 0.0 }
 0x375   :  { %v1463_v8 = vsel %vm699_vm0, %v4319_v0, 0.0 }
 0x382   :  { %3636 = vrot.lane.b32.xlu1 %v4161_v30, %s3932_s0 }
 0x38a   :  { %3641 = vrot.lane.b32.xlu0 %v4161_v30, %s3933_s26 }
 0x3a6   :  { %1461 = vadd.xlane.f32.xlu1 %v1460_v6 }
 0x3a9   :  { %1464 = vadd.xlane.f32.xlu0 %v1463_v8 }
 0x3d5   :  { %v1375_v47 = vpop.xlane.xlu0 %1374 }
 0x3d6   :  { %v1415_v5 = vsub.f32 %v4255_v7, %v1375_v47 }
 0x3d8   :  { %v1434_v44 = vmul.f32 1.442695, %v1415_v5 }
 0x3da   :  { %3698 = vpow2.f32 %v1434_v44 }
 0x3e4   :  { %v4326_v48 = vpop.eup %3698 }
 0x3e5   :  { %v1469_v49 = vsel %vm699_vm0, %v4326_v48, 0.0 }
 0x3e6   :  { %1470 = vadd.xlane.f32.xlu0 %v1469_v49 }
 0x3e9   :  { %v1393_v50 = vpop.xlane.xlu0 %1392 }
 0x3ea   :  { %v1421_v51 = vsub.f32 %v4259_v53, %v1393_v50  ;;  %v1390_v52 = vpop.xlane.xlu1 %1389 }
 0x3eb   :  { %v1420_v13 = vsub.f32 %v4261_v55, %v1390_v52 }
 0x3ec   :  { %v1446_v54 = vmul.f32 1.442695, %v1421_v51 }
 0x3ed   :  { %v1372_v16 = vpop.xlane.xlu0 %1371  ;;  %v1444_v58 = vmul.f32 1.442695, %v1420_v13 }
 0x3ee   :  { %3700 = vpow2.f32 %v1446_v54  ;;  %v1414_v57 = vsub.f32 %v4263_v56, %v1372_v16  ;;  %v1378_v7 = vpop.xlane.xlu1 %1377 }
 0x3ef   :  { %v1416_v62 = vsub.f32 %v4267_v14, %v1378_v7 }
 0x3f0   :  { %v1432_v61 = vmul.f32 1.442695, %v1414_v57 }
 0x3f1   :  { %v1381_v63 = vpop.xlane.xlu0 %1380  ;;  %v1436_v53 = vmul.f32 1.442695, %v1416_v62 }
 0x3f2   :  { %3702 = vpow2.f32 %v1432_v61  ;;  %v1417_v1 = vsub.f32 %v4271_v59, %v1381_v63  ;;  %v1402_v9 = vpop.xlane.xlu1 %1401 }
 0x3f3   :  { %3704 = vpow2.f32 %v1444_v58  ;;  %v1424_v15 = vsub.f32 %v4277_v2, %v1402_v9 }
 0x3f4   :  { %v1438_v11 = vmul.f32 1.442695, %v1417_v1 }
 0x3f5   :  { %v1405_v55 = vpop.xlane.xlu0 %1404  ;;  %v1452_v29 = vmul.f32 1.442695, %v1424_v15 }
 0x3f6   :  { %3706 = vpow2.f32 %v1438_v11  ;;  %v1425_v18 = vsub.f32 %v4279_v3, %v1405_v55  ;;  %v1384_v56 = vpop.xlane.xlu1 %1383 }
 0x3f7   :  { %3708 = vpow2.f32 %v1436_v53  ;;  %v1418_v27 = vsub.f32 %v4283_v10, %v1384_v56 }
 0x3f8   :  { %v4337_v26 = vpop.eup %3700  ;;  %v1454_v14 = vmul.f32 1.442695, %v1425_v18 }
 0x3f9   :  { %v1387_v34 = vpop.xlane.xlu0 %1386  ;;  %v1487_v59 = vsel %vm699_vm0, %v4337_v26, 0.0  ;;  %v1440_v3 = vmul.f32 1.442695, %v1418_v27 }
 0x3fa   :  { %3710 = vpow2.f32 %v1454_v14  ;;  %v1419_v36 = vsub.f32 %v4287_v21, %v1387_v34  ;;  %1488 = vadd.xlane.f32.xlu0 %v1487_v59  ;;  %v1396_v2 = vpop.xlane.xlu1 %1395 }
 0x3fb   :  { %3712 = vpow2.f32 %v1452_v29  ;;  %v1422_v39 = vsub.f32 %v4291_v28, %v1396_v2 }
 0x3fc   :  { %v4343_v37 = vpop.eup %3702  ;;  %v1442_v38 = vmul.f32 1.442695, %v1419_v36 }
 0x3fd   :  { %v1399_v40 = vpop.xlane.xlu0 %1398  ;;  %v1466_v10 = vsel %vm699_vm0, %v4343_v37, 0.0  ;;  %v4348_v41 = vpop.eup %3704  ;;  %v1448_v45 = vmul.f32 1.442695, %v1422_v39 }
 0x3fe   :  { %3714 = vpow2.f32 %v1442_v38  ;;  %v1423_v42 = vsub.f32 %v4295_v32, %v1399_v40  ;;  %1467 = vadd.xlane.f32.xlu1 %v1466_v10  ;;  %v1408_v21 = vpop.xlane.xlu1 %1407  ;;  %v1484_v5 = vsel %vm699_vm0, %v4348_v41, 0.0 }
 0x3ff   :  { %3716 = vpow2.f32 %v1440_v3  ;;  %v1426_v8 = vsub.f32 %v4299_v33, %v1408_v21 }
 0x400   :  { %v4351_v43 = vpop.eup %3706  ;;  %v1450_v6 = vmul.f32 1.442695, %v1423_v42 }
 0x401   :  { %v1411_v47 = vpop.xlane.xlu0 %1410  ;;  %v1475_v28 = vsel %vm699_vm0, %v4351_v43, 0.0  ;;  %v4358_v44 = vpop.eup %3708  ;;  %v1456_v50 = vmul.f32 1.442695, %v1426_v8 }
 0x402   :  { %3718 = vpow2.f32 %v1450_v6  ;;  %v1427_v32 = vsub.f32 %v4303_v31, %v1411_v47  ;;  %1476 = vadd.xlane.f32.xlu0 %v1475_v28  ;;  %1485 = vadd.xlane.f32.xlu1 %v1484_v5  ;;  %v1472_v52 = vsel %vm699_vm0, %v4358_v44, 0.0  ;;  %v3637_v15 = vpop.permute.xlu1 %3636 }
 0x403   :  { %3720 = vpow2.f32 %v1448_v45  ;;  %v3639_v27 = vunpack.i.h.bf16 %v3637_v15  ;;  %v3638_v34 = vunpack.i.l.bf16 %v3637_v15 }
 0x404   :  { %v4361_v49 = vpop.eup %3710  ;;  %v1458_v51 = vmul.f32 1.442695, %v1427_v32 }
 0x405   :  { %v1499_v33 = vsel %vm699_vm0, %v4361_v49, 0.0  ;;  %v4367_v54 = vpop.eup %3712  ;;  %v3642_v55 = vpop.permute.xlu0 %3641  ;;  %v3447_v2 = vpack.c.bf16 %v3639_v27, %v3638_v34 }
 0x406   :  { %3722 = vpow2.f32 %v1458_v51  ;;  %1500 = vadd.xlane.f32.xlu0 %v1499_v33  ;;  %1473 = vadd.xlane.f32.xlu1 %v1472_v52  ;;  %v1496_v16 = vsel %vm699_vm0, %v4367_v54, 0.0  ;;  %v3644_v21 = vunpack.i.h.bf16 %v3642_v55  ;;  %v3643_v45 = vunpack.i.l.bf16 %v3642_v55 }
 0x407   :  { %3724 = vpow2.f32 %v1456_v50 }
 0x408   :  { %v4369_v13 = vpop.eup %3714  ;;  %v3451_v28 = vpack.c.bf16 %v3644_v21, %v3643_v45  ;;  %v2270_v45 = vld [vmem:[#allocation7 + $0x30] sm:$0xff] }
 0x409   :  { %v1481_v31 = vsel %vm699_vm0, %v4369_v13, 0.0  ;;  %v4375_v57 = vpop.eup %3716 }
 0x40a   :  { %1482 = vadd.xlane.f32.xlu0 %v1481_v31  ;;  %1497 = vadd.xlane.f32.xlu1 %v1496_v16  ;;  %v1478_v61 = vsel %vm699_vm0, %v4375_v57, 0.0 }
 0x40c   :  { %v4377_v7 = vpop.eup %3718 }
 0x40d   :  { %v1493_v58 = vsel %vm699_vm0, %v4377_v7, 0.0  ;;  %v4383_v62 = vpop.eup %3720 }
 0x40e   :  { %1494 = vadd.xlane.f32.xlu0 %v1493_v58  ;;  %1479 = vadd.xlane.f32.xlu1 %v1478_v61  ;;  %v1490_v9 = vsel %vm699_vm0, %v4383_v62, 0.0 }
 0x410   :  { %v4385_v63 = vpop.eup %3722 }
 0x411   :  { %v1505_v1 = vsel %vm699_vm0, %v4385_v63, 0.0  ;;  %v4391_v53 = vpop.eup %3724 }
 0x412   :  { %1506 = vadd.xlane.f32.xlu0 %v1505_v1  ;;  %1491 = vadd.xlane.f32.xlu1 %v1490_v9  ;;  %v1502_v11 = vsel %vm699_vm0, %v4391_v53, 0.0 }
 0x416   :  { %1503 = vadd.xlane.f32.xlu1 %v1502_v11 }
 0x427   :  { %3646 = vrot.lane.b32.xlu1 %v4161_v30, %s3917_s5 }
 0x428   :  { %3651 = vrot.lane.b32.xlu0 %v4161_v30, %s3915_s18 }
 0x433   :  { %v1462_v18 = vpop.xlane.xlu1 %1461 }
 0x434   :  { %3726 = vrcp.f32 %v1462_v18 }
 0x436   :  { %v1465_v56 = vpop.xlane.xlu0 %1464 }
 0x437   :  { %3728 = vrcp.f32 %v1465_v56 }
 0x43e   :  { %v3727_v29 = vpop.eup %3726 }
 0x43f   :  { %v1524_v14 = vmul.f32 %v3727_v29, %v4317_v46 }
 0x441   :  { %v3729_v59 = vpop.eup %3728  ;;  %3232 = vmatprep.mubr.msk.f32.mxu0 %vm699_vm0, %v1524_v14 }
 0x442   :  { %v1525_v36 = vmul.f32 %v3729_v59, %v4319_v0 }
 0x444   :  { %3233 = vmatmul.mubr.msk.f32.vlgmr.msra.gmra.mrb[8].mxu0 %vm699_vm0, %v1525_v36 }
 0x445   :  { %3442 = vmatpush3.bf16.msra.mxu0 %v4235_v20 }
 0x446   :  { %3448 = vmatprep.subr.bf16.mxu0 %v3447_v2 }
 0x473   :  { %v1471_v30 = vpop.xlane.xlu0 %1470 }
 0x474   :  { %3730 = vrcp.f32 %v1471_v30 }
 0x47e   :  { %v3731_v42 = vpop.eup %3730 }
 0x47f   :  { %v1527_v47 = vmul.f32 %v3731_v42, %v4326_v48  ;;  %v2268_v42 = vld [vmem:[#allocation7 + $0x20] sm:$0xff] }
 0x487   :  { %v1489_v3 = vpop.xlane.xlu0 %1488 }
 0x48b   :  { %v1468_v38 = vpop.xlane.xlu1 %1467 }
 0x48c   :  { %3732 = vrcp.f32 %v1468_v38 }
 0x48f   :  { %v1477_v39 = vpop.xlane.xlu0 %1476  ;;  %v1486_v46 = vpop.xlane.xlu1 %1485 }
 0x490   :  { %3734 = vrcp.f32 %v1477_v39 }
 0x491   :  { %3736 = vrcp.f32 %v1486_v46 }
 0x493   :  { %v1501_v40 = vpop.xlane.xlu0 %1500  ;;  %v1474_v10 = vpop.xlane.xlu1 %1473 }
 0x494   :  { %3738 = vrcp.f32 %v1474_v10 }
 0x495   :  { %3740 = vrcp.f32 %v1489_v3 }
 0x496   :  { %v3733_v0 = vpop.eup %3732 }
 0x497   :  { %v1483_v6 = vpop.xlane.xlu0 %1482  ;;  %v1498_v8 = vpop.xlane.xlu1 %1497  ;;  %v1526_v20 = vmul.f32 %v3733_v0, %v4343_v37 }
 0x498   :  { %3742 = vrcp.f32 %v1498_v8 }
 0x499   :  { %3239 = vmatprep.mubr.msk.f32.mxu1 %vm699_vm0, %v1526_v20  ;;  %3744 = vrcp.f32 %v1483_v6  ;;  %v2271_v6 = vld [vmem:[#allocation7 + $0x38] sm:$0xff] }
 0x49a   :  { %3240 = vmatmul.mubr.msk.f32.vlgmr.msra.gmra.mrb[14].mxu1 %vm699_vm0, %v1527_v47  ;;  %v3735_v50 = vpop.eup %3734  ;;  %v3475_v20 = vpack.c.bf16 %v2271_v6, %v2270_v45 }
 0x49b   :  { %3446 = vmatpush3.bf16.msra.mxu1 %v4241_v35  ;;  %v1495_v5 = vpop.xlane.xlu0 %1494  ;;  %v1480_v32 = vpop.xlane.xlu1 %1479  ;;  %v1529_v31 = vmul.f32 %v3735_v50, %v4351_v43  ;;  %v2274_v50 = vld [vmem:[#allocation7 + $0x50] sm:$0xff] }
 0x49c   :  { %3452 = vmatprep.subr.bf16.mxu1 %v3451_v28  ;;  %3746 = vrcp.f32 %v1480_v32  ;;  %v3737_v51 = vpop.eup %3736 }
 0x49d   :  { %3748 = vrcp.f32 %v1501_v40  ;;  %v1532_v35 = vmul.f32 %v3737_v51, %v4348_v41  ;;  %v2267_v40 = vld [vmem:[#allocation7 + $0x18] sm:$0xff] }
 0x49e   :  { %v3739_v33 = vpop.eup %3738  ;;  %3750 = vrcp.f32 %v1495_v5  ;;  %v2273_v5 = vld [vmem:[#allocation7 + $0x48] sm:$0xff]  ;;  %v2275_v51 = vld [vmem:[#allocation7 + $0x58] sm:$0xff] }
 0x49f   :  { %v1507_v37 = vpop.xlane.xlu0 %1506  ;;  %v1492_v48 = vpop.xlane.xlu1 %1491  ;;  %v1528_v52 = vmul.f32 %v3739_v33, %v4358_v44 }
 0x4a0   :  { %3752 = vrcp.f32 %v1492_v48  ;;  %v3741_v16 = vpop.eup %3740 }
 0x4a1   :  { %3246 = vmatprep.mubr.msk.f32.mxu0 %vm699_vm0, %v1528_v52  ;;  %3754 = vrcp.f32 %v1507_v37  ;;  %v1533_v44 = vmul.f32 %v3741_v16, %v4337_v26  ;;  %v3483_v37 = vpack.c.bf16 %v2275_v51, %v2274_v50  ;;  %v2277_v16 = vld [vmem:[#allocation7 + $0x68] sm:$0xff] }
 0x4a2   :  { %v3743_v58 = vpop.eup %3742  ;;  %3247 = vmatmul.mubr.msk.f32.vlgmr.msra.gmra.mrb[10].mxu0 %vm699_vm0, %v1529_v31  ;;  %v2276_v31 = vld [vmem:[#allocation7 + $0x60] sm:$0xff] }
 0x4a3   :  { %v1504_v61 = vpop.xlane.xlu1 %1503  ;;  %3450 = vmatpush3.bf16.msra.mxu0 %v3447_v2  ;;  %v3652_v1 = vpop.permute.xlu0 %3651  ;;  %3260 = vmatprep.mubr.msk.f32.mxu0 %vm699_vm0, %v1532_v35  ;;  %v1536_v43 = vmul.f32 %v3743_v58, %v4367_v54  ;;  %v3487_v58 = vpack.c.bf16 %v2277_v16, %v2276_v31  ;;  %v2586_v16 = vld [vmem:[#allocation8 + $0x8] sm:$0xff] }
 0x4a4   :  { %3756 = vrcp.f32 %v1504_v61  ;;  %v3745_v9 = vpop.eup %3744  ;;  %v3654_v15 = vunpack.i.h.bf16 %v3652_v1  ;;  %v3653_v55 = vunpack.i.l.bf16 %v3652_v1 }
 0x4a5   :  { %v1531_v27 = vmul.f32 %v3745_v9, %v4369_v13  ;;  %v2279_v9 = vld [vmem:[#allocation7 + $0x78] sm:$0xff] }
 0x4a6   :  { %v3747_v11 = vpop.eup %3746  ;;  %3261 = vmatmul.mubr.msk.f32.vlgmr.msra.gmra.mrb[12].mxu0 %vm699_vm0, %v1533_v44  ;;  %v3459_v59 = vpack.c.bf16 %v3654_v15, %v3653_v55  ;;  %v2278_v44 = vld [vmem:[#allocation7 + $0x70] sm:$0xff] }
 0x4a7   :  { %v3647_v41 = vpop.permute.xlu1 %3646  ;;  %3274 = vmatprep.mubr.msk.f32.mxu0 %vm699_vm0, %v1536_v43  ;;  %v1530_v29 = vmul.f32 %v3747_v11, %v4375_v57  ;;  %v3749_v14 = vpop.eup %3748  ;;  %v3491_v11 = vpack.c.bf16 %v2279_v9, %v2278_v44  ;;  %v2996_v9 = vld [vmem:[%s4559_s4] ss:$0 sm:$0xff] }
 0x4a8   :  { %v3649_v18 = vunpack.i.h.bf16 %v3647_v41  ;;  %v3648_v56 = vunpack.i.l.bf16 %v3647_v41  ;;  %v3751_v34 = vpop.eup %3750  ;;  %v1537_v13 = vmul.f32 %v3749_v14, %v4361_v49 }
 0x4a9   :  { %3253 = vmatprep.mubr.msk.f32.mxu1 %vm699_vm0, %v1530_v29  ;;  %v1535_v30 = vmul.f32 %v3751_v34, %v4377_v7  ;;  %v2264_v7 = vld [vmem:[#allocation7] sm:$0xff] }
 0x4aa   :  { %v3455_v26 = vpack.c.bf16 %v3649_v18, %v3648_v56  ;;  %v3753_v54 = vpop.eup %3752  ;;  %3254 = vmatmul.mubr.msk.f32.vlgmr.msra.gmra.mrb[16].mxu1 %vm699_vm0, %v1531_v27 }
 0x4ab   :  { %3454 = vmatpush3.bf16.msra.mxu1 %v3451_v28  ;;  %v1534_v36 = vmul.f32 %v3753_v54, %v4383_v62  ;;  %v3755_v2 = vpop.eup %3754  ;;  %v2265_v62 = vld [vmem:[#allocation7 + $0x8] sm:$0xff]  ;;  %v2272_v28 = vld [vmem:[#allocation7 + $0x40] sm:$0xff] }
 0x4ac   :  { %3456 = vmatprep.subr.bf16.mxu0 %v3455_v26  ;;  %3460 = vmatprep.subr.bf16.mxu1 %v3459_v59  ;;  %v1539_v38 = vmul.f32 %v3755_v2, %v4385_v63  ;;  %v3463_v49 = vpack.c.bf16 %v2265_v62, %v2264_v7  ;;  %v2269_v63 = vld [vmem:[#allocation7 + $0x28] sm:$0xff]  ;;  %v3479_v32 = vpack.c.bf16 %v2273_v5, %v2272_v28 }
 0x4ad   :  { %3458 = vmatpush3.bf16.msra.mxu0 %v3455_v26  ;;  %3267 = vmatprep.mubr.msk.f32.mxu1 %vm699_vm0, %v1534_v36  ;;  %v3471_v0 = vpack.c.bf16 %v2269_v63, %v2268_v42 }
 0x4ae   :  { %v3757_v57 = vpop.eup %3756  ;;  %3268 = vmatmul.mubr.msk.f32.vlgmr.msra.gmra.mrb[18].mxu1 %vm699_vm0, %v1535_v30  ;;  %3464 = vmatprep.subr.bf16.mxu0 %v3463_v49 }
 0x4af   :  { %v1538_v3 = vmul.f32 %v3757_v57, %v4391_v53  ;;  %3462 = vmatpush3.bf16.msra.mxu1 %v3459_v59  ;;  %v2266_v53 = vld [vmem:[#allocation7 + $0x10] sm:$0xff] }
 0x4b0   :  { %3275 = vmatmul.mubr.msk.f32.vlgmr.msra.gmra.mrb[14].mxu0 %vm699_vm0, %v1537_v13  ;;  %v3467_v10 = vpack.c.bf16 %v2267_v40, %v2266_v53 }
 0x4b1   :  { %3281 = vmatprep.mubr.msk.f32.mxu1 %vm699_vm0, %v1538_v3  ;;  %3466 = vmatpush3.bf16.msra.mxu0 %v3463_v49 }
 0x4b2   :  { %3282 = vmatmul.mubr.msk.f32.vlgmr.msra.gmra.mrb[20].mxu1 %vm699_vm0, %v1539_v38  ;;  %3468 = vmatprep.subr.bf16.mxu0 %v3467_v10 }
 0x4b3   :  { %2737 = vmatprep.mubr.f32.mxu1 %v3924_v19 }
 0x4b5   :  { %3470 = vmatpush3.bf16.msra.mxu0 %v3467_v10 }
 0x4b6   :  { %3472 = vmatprep.subr.bf16.mxu0 %v3471_v0 }
 0x4b9   :  { %3474 = vmatpush3.bf16.msra.mxu0 %v3471_v0 }
 0x4ba   :  { %3476 = vmatprep.subr.bf16.mxu0 %v3475_v20 }
 0x4bd   :  { %3478 = vmatpush3.bf16.msra.mxu0 %v3475_v20 }
 0x4be   :  { %3480 = vmatprep.subr.bf16.mxu0 %v3479_v32 }
 0x4c1   :  { %3482 = vmatpush3.bf16.msra.mxu0 %v3479_v32 }
 0x4c2   :  { %3484 = vmatprep.subr.bf16.mxu0 %v3483_v37 }
 0x4c5   :  { %3486 = vmatpush3.bf16.msra.mxu0 %v3483_v37 }
 0x4c6   :  { %3488 = vmatprep.subr.bf16.mxu0 %v3487_v58 }
 0x4c9   :  { %3490 = vmatpush3.bf16.msra.mxu0 %v3487_v58  ;;  %v2585_v58 = vld [vmem:[#allocation8] sm:$0xff] }
 0x4ca   :  { %3492 = vmatprep.subr.bf16.mxu0 %v3491_v11 }
 0x4cd   :  { %3494 = vmatpush3.bf16.msra.mxu0 %v3491_v11 }
 0x517   :  { %v4434_v39 = vpop.f32.mrb[8].mxu0 }
 0x518   :  { %v4436_v46 = vpop.f32.mrb[9].mxu0 }
 0x56d   :  { %v3241_v21 = vpop.f32.mrb[14].mxu1 }
 0x56e   :  { %v1693_v8 = vpop.f32.mrb[15].mxu1 }
 0x56f   :  { %v3655_v47 = vpack.i.bf16 %v3241_v21, %v1693_v8 }
 0x571   :  { %3656 = vrot.lane.b32.xlu1 %v3655_v47, %s3915_s18 }
 0x575   :  { %v3248_v33 = vpop.f32.mrb[10].mxu0 }
 0x576   :  { %v1774_v48 = vpop.f32.mrb[11].mxu0 }
 0x577   :  { %v3660_v52 = vpack.i.bf16 %v3248_v33, %v1774_v48 }
 0x579   :  { %3661 = vrot.lane.b32.xlu0 %v3660_v52, %s3917_s5  ;;  %v3262_v35 = vpop.f32.mrb[12].mxu0 }
 0x57a   :  { %v1936_v61 = vpop.f32.mrb[13].mxu0 }
 0x57b   :  { %v3665_v1 = vpack.i.bf16 %v3262_v35, %v1936_v61  ;;  %v2588_v35 = vld [vmem:[#allocation8 + $0x18] sm:$0xff] }
 0x57c   :  { %v3495_v61 = vpack.c.bf16 %v2588_v35, %v2586_v16  ;;  %v2590_v16 = vld [vmem:[#allocation8 + $0x28] sm:$0xff]  ;;  %v2592_v35 = vld [vmem:[#allocation8 + $0x38] sm:$0xff] }
 0x57d   :  { %v3255_v43 = vpop.f32.mrb[16].mxu1  ;;  %3666 = vrot.lane.b32.xlu0 %v3665_v1, %s3932_s0  ;;  %v2587_v1 = vld [vmem:[#allocation8 + $0x10] sm:$0xff] }
 0x57e   :  { %v1855_v15 = vpop.f32.mrb[17].mxu1  ;;  %v3497_v44 = vpack.c.bf16 %v2587_v1, %v2585_v58  ;;  %3496 = vmatprep.subr.bf16.mxu1 %v3495_v61  ;;  %v3499_v58 = vpack.c.bf16 %v2592_v35, %v2590_v16  ;;  %v2589_v61 = vld [vmem:[#allocation8 + $0x20] sm:$0xff]  ;;  %v2591_v1 = vld [vmem:[#allocation8 + $0x30] sm:$0xff]  ;;  %v2773_v35 = vld [vmem:[#allocation10 + $0x98] sm:$0xff] }
 0x57f   :  { %v3670_v55 = vpack.i.bf16 %v3255_v43, %v1855_v15  ;;  %v2772_v16 = vld [vmem:[#allocation10 + $0x90] sm:$0xff] }
 0x580   :  { %3498 = vmatpush1.bf16.msra.mxu1 %v3497_v44  ;;  %v3501_v44 = vpack.c.bf16 %v2591_v1, %v2589_v61  ;;  %v3531_v61 = vpack.c.bf16 %v2773_v35, %v2772_v16  ;;  %v2756_v1 = vld [vmem:[#allocation10 + $0x10] sm:$0xff] }
 0x581   :  { %3671 = vrot.lane.b32.xlu1 %v3670_v55, %s3933_s26  ;;  %v3269_v41 = vpop.f32.mrb[18].mxu1  ;;  %3500 = vmatprep.subr.bf16.mxu1 %v3499_v58 }
 0x582   :  { %v2017_v18 = vpop.f32.mrb[19].mxu1 }
 0x583   :  { %v3276_v56 = vpop.f32.mrb[14].mxu0  ;;  %v3680_v29 = vpack.i.bf16 %v3269_v41, %v2017_v18 }
 0x584   :  { %v2098_v14 = vpop.f32.mrb[15].mxu0  ;;  %3502 = vmatpush1.bf16.msra.mxu1 %v3501_v44  ;;  %v2757_v44 = vld [vmem:[#allocation10 + $0x18] sm:$0xff] }
 0x585   :  { %v3675_v27 = vpack.i.bf16 %v3276_v56, %v2098_v14  ;;  %3681 = vrot.lane.b32.xlu1 %v3680_v29, %s3931_s29  ;;  %v3283_v34 = vpop.f32.mrb[20].mxu1 }
 0x586   :  { %v2179_v26 = vpop.f32.mrb[21].mxu1 }
 0x587   :  { %3676 = vrot.lane.b32.xlu0 %v3675_v27, %s3929_s28  ;;  %v3685_v54 = vpack.i.bf16 %v3283_v34, %v2179_v26  ;;  %v3762_v34 = vld [vmem:[#allocation2 + $0x8] sm:$0x3] }
 0x589   :  { %3686 = vrot.lane.b32.xlu1 %v3685_v54, %s3930_s2 }
 0x5e3   :  { %v3657_v59 = vpop.permute.xlu1 %3656 }
 0x5e4   :  { %v3659_v2 = vunpack.i.h.bf16 %v3657_v59  ;;  %v3658_v30 = vunpack.i.l.bf16 %v3657_v59 }
 0x5e6   :  { %v2245_v38 = vsel %vm699_vm0, %v4434_v39, %v3659_v2  ;;  %v2244_v7 = vsel %vm699_vm0, %v4436_v46, %v3658_v30 }
 0x5eb   :  { %v3662_v36 = vpop.permute.xlu0 %3661 }
 0x5ec   :  { %v3664_v57 = vunpack.i.h.bf16 %v3662_v36  ;;  %v3663_v13 = vunpack.i.l.bf16 %v3662_v36  ;;  %v3763_v36 = vld [vmem:[#allocation2] sm:$0x3] }
 0x5ee   :  { %v2247_v40 = vsel %vm2246_vm4, %v2244_v7, %v3663_v13  ;;  %v2248_v10 = vsel %vm2246_vm4, %v2245_v38, %v3664_v57  ;;  %v3764_v57 = vld [vmem:[#allocation2 + $0xa] sm:$0x3] }
 0x5ef   :  { %v3667_v62 = vpop.permute.xlu0 %3666 }
 0x5f0   :  { %v3669_v0 = vunpack.i.h.bf16 %v3667_v62  ;;  %v3668_v21 = vunpack.i.l.bf16 %v3667_v62  ;;  %v3766_v62 = vld [vmem:[#allocation2 + $0x2] sm:$0x3] }
 0x5f3   :  { %v3672_v3 = vpop.permute.xlu1 %3671 }
 0x5f4   :  { %v3674_v49 = vunpack.i.h.bf16 %v3672_v3  ;;  %v3673_v53 = vunpack.i.l.bf16 %v3672_v3  ;;  %v3765_v3 = vld [vmem:[#allocation2 + $0xc] sm:$0x3] }
 0x5f6   :  { %v2250_v42 = vsel %vm2249_vm5, %v2247_v40, %v3673_v53  ;;  %v2251_v63 = vsel %vm2249_vm5, %v2248_v10, %v3674_v49  ;;  %v3767_v53 = vld [vmem:[#allocation2 + $0x4] sm:$0x3]  ;;  %v3768_v10 = vld [vmem:[#allocation2 + $0xe] sm:$0x3] }
 0x5f7   :  { %v3682_v45 = vpop.permute.xlu1 %3681  ;;  %v2254_v39 = vsel %vm2252_vm6, %v2251_v63, %v3669_v0  ;;  %v2253_v46 = vsel %vm2252_vm6, %v2250_v42, %v3668_v21  ;;  %v3769_v21 = vld [vmem:[#allocation2 + $0x6] sm:$0x3] }
 0x5f8   :  { %v3684_v6 = vunpack.i.h.bf16 %v3682_v45  ;;  %v3683_v8 = vunpack.i.l.bf16 %v3682_v45 }
 0x5f9   :  { %v3677_v20 = vpop.permute.xlu0 %3676 }
 0x5fa   :  { %v3679_v47 = vunpack.i.h.bf16 %v3677_v20  ;;  %v3678_v28 = vunpack.i.l.bf16 %v3677_v20  ;;  %v2257_v5 = vsel %vm2255_vm7, %v2254_v39, %v3684_v6  ;;  %v2256_v32 = vsel %vm2255_vm7, %v2253_v46, %v3683_v8 }
 0x5fb   :  { %v3687_v50 = vpop.permute.xlu1 %3686 }
 0x5fc   :  { %v2259_v51 = vsel %vm2258_vm8, %v2256_v32, %v3678_v28  ;;  %v2260_v33 = vsel %vm2258_vm8, %v2257_v5, %v3679_v47  ;;  %v3689_v37 = vunpack.i.h.bf16 %v3687_v50  ;;  %v3688_v48 = vunpack.i.l.bf16 %v3687_v50 }
 0x5fe   :  { %v2262_v52 = vsel %vm2261_vm9, %v2259_v51, %v3688_v48  ;;  %v2263_v31 = vsel %vm2261_vm9, %v2260_v33, %v3689_v37 }
 0x5ff   :  { %3316 = vmatprep.mubr.f32.mxu0 %v2262_v52 }
 0x600   :  { %3317 = vmatmul.mubr.f32.vlgmr.msra.gmra.mrb[16].mxu0 %v2263_v31 }
 0x6d3   :  { %v3318_v43 = vpop.f32.mrb[16].mxu0 }
 0x6d4   :  { %v2359_v11 = vadd.f32 %v3318_v43, %v2996_v9  ;;  %v2353_v15 = vpop.f32.mrb[17].mxu0  ;;  %v2596_v43 = vld [vmem:[#allocation8 + $0x58] sm:$0xff] }
 0x6d5   :  { %v2354_v55 = vadd.f32 %v2996_v9, %v2353_v15  ;;  %v2594_v9 = vld [vmem:[#allocation8 + $0x48] sm:$0xff]  ;;  %v2593_v15 = vld [vmem:[#allocation8 + $0x40] sm:$0xff] }
 0x6d6   :  { %v2381_v41 = vcombine.high %v2359_v11, %v2359_v11  ;;  %v2388_v18 = vrot.slane %v2359_v11, %v4078_v12  ;;  %v3503_v11 = vpack.c.bf16 %v2596_v43, %v2594_v9  ;;  %v2774_v9 = vld [vmem:[#allocation10 + $0xa0] sm:$0xff]  ;;  %v2775_v43 = vld [vmem:[#allocation10 + $0xa8] sm:$0xff] }
 0x6d7   :  { %v2364_v56 = vcombine.high %v2354_v55, %v2354_v55  ;;  %v2371_v29 = vrot.slane %v2354_v55, %v4078_v12  ;;  %v2595_v55 = vld [vmem:[#allocation8 + $0x50] sm:$0xff] }
 0x6d8   :  { %v2395_v14 = vrot.slane %v2381_v41, %v4078_v12  ;;  %v2396_v27 = vcombine.high %v2388_v18, %v2388_v18  ;;  %v4455_v26 = vadd.f32 %v3762_v34, %v2388_v18  ;;  %v2598_v41 = vld [vmem:[#allocation8 + $0x68] sm:$0xff]  ;;  %v3505_v18 = vpack.c.bf16 %v2595_v55, %v2593_v15  ;;  %3504 = vmatprep.subr.bf16.mxu1 %v3503_v11  ;;  %v2758_v55 = vld [vmem:[#allocation10 + $0x20] sm:$0xff] }
 0x6d9   :  { %v2378_v54 = vrot.slane %v2364_v56, %v4078_v12  ;;  %v2379_v59 = vcombine.high %v2371_v29, %v2371_v29  ;;  %v4458_v2 = vadd.f32 %v3763_v36, %v2371_v29  ;;  %v2600_v56 = vld [vmem:[#allocation8 + $0x78] sm:$0xff]  ;;  %v2597_v29 = vld [vmem:[#allocation8 + $0x60] sm:$0xff]  ;;  %v2602_v34 = vld [vmem:[#allocation8 + $0x88] sm:$0xff]  ;;  %v3533_v11 = vpack.c.bf16 %v2757_v44, %v2756_v1 }
 0x6da   :  { %v2397_v30 = vcombine.high %v2395_v14, %v2395_v14  ;;  %v4460_v13 = vadd.f32 %v3764_v57, %v2396_v27  ;;  %v4462_v38 = vadd.f32 %v3765_v3, %v2395_v14  ;;  %v2419_v63 = vmul.f32 %v4455_v26, %v4455_v26  ;;  %v2599_v14 = vld [vmem:[#allocation8 + $0x70] sm:$0xff]  ;;  %3506 = vmatpush1.bf16.msra.mxu1 %v3505_v18  ;;  %v2606_v3 = vld [vmem:[#allocation8 + $0xa8] sm:$0xff] }
 0x6db   :  { %v2380_v7 = vcombine.high %v2378_v54, %v2378_v54  ;;  %v4464_v49 = vadd.f32 %v3766_v62, %v2379_v59  ;;  %v4466_v40 = vadd.f32 %v3767_v53, %v2378_v54  ;;  %v2415_v6 = vmul.f32 %v4458_v2, %v4458_v2  ;;  %v2604_v54 = vld [vmem:[#allocation8 + $0x98] sm:$0xff]  ;;  %v2603_v57 = vld [vmem:[#allocation8 + $0x90] sm:$0xff] }
 0x6dc   :  { %v4468_v42 = vadd.f32 %v3768_v10, %v2397_v30  ;;  %v2420_v0 = vmul.f32 %v4460_v13, %v4460_v13  ;;  %v2421_v20 = vmul.f32 %v4462_v38, %v4462_v38  ;;  %v3507_v27 = vpack.c.bf16 %v2600_v56, %v2598_v41  ;;  %v2601_v30 = vld [vmem:[#allocation8 + $0x80] sm:$0xff]  ;;  %v2759_v41 = vld [vmem:[#allocation10 + $0x28] sm:$0xff]  ;;  %v2776_v18 = vld [vmem:[#allocation10 + $0xb0] sm:$0xff] }
 0x6dd   :  { %v4474_v45 = vadd.f32 %v3769_v21, %v2380_v7  ;;  %v2416_v8 = vmul.f32 %v4464_v49, %v4464_v49  ;;  %v2417_v28 = vmul.f32 %v4466_v40, %v4466_v40  ;;  %v3509_v59 = vpack.c.bf16 %v2599_v14, %v2597_v29  ;;  %v2608_v7 = vld [vmem:[#allocation8 + $0xb8] sm:$0xff]  ;;  %v2605_v10 = vld [vmem:[#allocation8 + $0xa0] sm:$0xff] }
 0x6de   :  { %v2422_v39 = vmul.f32 %v4468_v42, %v4468_v42  ;;  %v2448_v47 = vcombine.low %v2419_v63, %v2420_v0  ;;  %3508 = vmatprep.subr.bf16.mxu1 %v3507_v27  ;;  %v3511_v36 = vpack.c.bf16 %v2604_v54, %v2602_v34  ;;  %v3513_v62 = vpack.c.bf16 %v2603_v57, %v2601_v30  ;;  %v2607_v63 = vld [vmem:[#allocation8 + $0xb0] sm:$0xff]  ;;  %v2610_v0 = vld [vmem:[#allocation8 + $0xc8] sm:$0xff]  ;;  %v2612_v21 = vld [vmem:[#allocation8 + $0xd8] sm:$0xff] }
 0x6df   :  { %v2418_v46 = vmul.f32 %v4474_v45, %v4474_v45  ;;  %v2431_v5 = vcombine.low %v2415_v6, %v2416_v8  ;;  %3510 = vmatpush1.bf16.msra.mxu1 %v3509_v59  ;;  %v3515_v53 = vpack.c.bf16 %v2608_v7, %v2606_v3  ;;  %v3517_v6 = vpack.c.bf16 %v2607_v63, %v2605_v10  ;;  %v2777_v56 = vld [vmem:[#allocation10 + $0xb8] sm:$0xff]  ;;  %v2760_v27 = vld [vmem:[#allocation10 + $0x30] sm:$0xff]  ;;  %v2778_v54 = vld [vmem:[#allocation10 + $0xc0] sm:$0xff] }
 0x6e0   :  { %v2449_v32 = vcombine.low %v2421_v20, %v2422_v39  ;;  %v2456_v51 = vrot.slane %v2448_v47, %v4078_v12  ;;  %3512 = vmatprep.subr.bf16.mxu1 %v3511_v36  ;;  %v3519_v8 = vpack.c.bf16 %v2612_v21, %v2610_v0  ;;  %v2609_v20 = vld [vmem:[#allocation8 + $0xc0] sm:$0xff]  ;;  %v2611_v39 = vld [vmem:[#allocation8 + $0xd0] sm:$0xff]  ;;  %v2614_v47 = vld [vmem:[#allocation8 + $0xe8] sm:$0xff]  ;;  %v3535_v15 = vpack.c.bf16 %v2775_v43, %v2774_v9 }
 0x6e1   :  { %v2432_v50 = vcombine.low %v2417_v28, %v2418_v46  ;;  %v2439_v37 = vrot.slane %v2431_v5, %v4078_v12  ;;  %v2616_v28 = vld [vmem:[#allocation8 + $0xf8] sm:$0xff]  ;;  %v3521_v46 = vpack.c.bf16 %v2611_v39, %v2609_v20  ;;  %v3537_v29 = vpack.c.bf16 %v2759_v41, %v2758_v55  ;;  %v2779_v59 = vld [vmem:[#allocation10 + $0xc8] sm:$0xff]  ;;  %v2762_v57 = vld [vmem:[#allocation10 + $0x40] sm:$0xff] }
 0x6e2   :  { %v2463_v33 = vrot.slane %v2449_v32, %v4078_v12  ;;  %v3523_v5 = vpack.c.bf16 %v2616_v28, %v2614_v47  ;;  %v2613_v32 = vld [vmem:[#allocation8 + $0xe0] sm:$0xff]  ;;  %v3539_v14 = vpack.c.bf16 %v2777_v56, %v2776_v18  ;;  %v2761_v34 = vld [vmem:[#allocation10 + $0x38] sm:$0xff]  ;;  %v3543_v30 = vpack.c.bf16 %v2779_v59, %v2778_v54  ;;  %v2763_v3 = vld [vmem:[#allocation10 + $0x48] sm:$0xff] }
 0x6e3   :  { %v2446_v48 = vrot.slane %v2432_v50, %v4078_v12  ;;  %3514 = vmatpush1.bf16.msra.mxu1 %v3513_v62  ;;  %v2615_v50 = vld [vmem:[#allocation8 + $0xf0] sm:$0xff]  ;;  %v3541_v36 = vpack.c.bf16 %v2761_v34, %v2760_v27  ;;  %v2781_v62 = vld [vmem:[#allocation10 + $0xd8] sm:$0xff]  ;;  %v2782_v21 = vld [vmem:[#allocation10 + $0xe0] sm:$0xff] }
 0x6e4   :  { %v2464_v52 = vcombine.low %v2456_v51, %v2463_v33  ;;  %3516 = vmatprep.subr.bf16.mxu1 %v3515_v53  ;;  %v3525_v51 = vpack.c.bf16 %v2615_v50, %v2613_v32  ;;  %v2770_v33 = vld [vmem:[#allocation10 + $0x80] sm:$0xff]  ;;  %v2780_v7 = vld [vmem:[#allocation10 + $0xd0] sm:$0xff]  ;;  %v3545_v53 = vpack.c.bf16 %v2763_v3, %v2762_v57  ;;  %v2765_v0 = vld [vmem:[#allocation10 + $0x58] sm:$0xff] }
 0x6e5   :  { %v2447_v31 = vcombine.low %v2439_v37, %v2446_v48  ;;  %v2771_v37 = vld [vmem:[#allocation10 + $0x88] sm:$0xff]  ;;  %v2754_v48 = vld [vmem:[#allocation10] sm:$0xff]  ;;  %v3547_v10 = vpack.c.bf16 %v2781_v62, %v2780_v7  ;;  %v2764_v63 = vld [vmem:[#allocation10 + $0x50] sm:$0xff] }
 0x6e6   :  { %2469 = vadd.xlane.f32.xlu1 %v2464_v52  ;;  %v3527_v52 = vpack.c.bf16 %v2771_v37, %v2770_v33  ;;  %v2997_v50 = vld [vmem:[%s4565_s10] ss:$0 sm:$0xff] }
 0x6e7   :  { %2467 = vadd.xlane.f32.xlu0 %v2447_v31  ;;  %3518 = vmatpush1.bf16.msra.mxu1 %v3517_v6  ;;  %v2755_v31 = vld [vmem:[#allocation10 + $0x8] sm:$0xff]  ;;  %v2563_v33 = vrot.slane %v2997_v50, %v4078_v12 }
 0x6e8   :  { %3520 = vmatprep.subr.bf16.mxu1 %v3519_v8  ;;  %v3529_v58 = vpack.c.bf16 %v2755_v31, %v2754_v48  ;;  %3528 = vmatprep.subr.bf16.mxu0 %v3527_v52  ;;  %v2783_v6 = vld [vmem:[#allocation10 + $0xe8] sm:$0xff]  ;;  %v3549_v8 = vpack.c.bf16 %v2765_v0, %v2764_v63 }
 0x6e9   :  { %v3551_v20 = vpack.c.bf16 %v2783_v6, %v2782_v21  ;;  %v2571_v52 = vcombine.high %v2563_v33, %v2563_v33  ;;  %v2766_v6 = vld [vmem:[#allocation10 + $0x60] sm:$0xff] }
 0x6ea   :  { %3530 = vmatpush3.bf16.msra.mxu0 %v3529_v58 }
 0x6eb   :  { %3522 = vmatpush1.bf16.msra.mxu1 %v3521_v46  ;;  %3532 = vmatprep.subr.bf16.mxu0 %v3531_v61 }
 0x6ec   :  { %3524 = vmatprep.subr.bf16.mxu1 %v3523_v5 }
 0x6ee   :  { %3534 = vmatpush3.bf16.msra.mxu0 %v3533_v11 }
 0x6ef   :  { %3526 = vmatpush1.bf16.msra.mxu1 %v3525_v51  ;;  %3536 = vmatprep.subr.bf16.mxu0 %v3535_v15  ;;  %v2556_v51 = vcombine.high %v2997_v50, %v2997_v50  ;;  %v2617_v50 = vld [vmem:[%s4561_s6] sm:$0x3] }
 0x6f1   :  { %v2570_v37 = vrot.slane %v2556_v51, %v4078_v12  ;;  %v2626_v51 = vrot.slane %v2617_v50, %v343_v60 }
 0x6f2   :  { %3538 = vmatpush3.bf16.msra.mxu0 %v3537_v29 }
 0x6f3   :  { %3540 = vmatprep.subr.bf16.mxu0 %v3539_v14  ;;  %v2572_v31 = vcombine.high %v2570_v37, %v2570_v37 }
 0x6f6   :  { %3542 = vmatpush3.bf16.msra.mxu0 %v3541_v36 }
 0x6f7   :  { %3544 = vmatprep.subr.bf16.mxu0 %v3543_v30 }
 0x6fa   :  { %3546 = vmatpush3.bf16.msra.mxu0 %v3545_v53 }
 0x6fb   :  { %3548 = vmatprep.subr.bf16.mxu0 %v3547_v10 }
 0x6fe   :  { %3550 = vmatpush3.bf16.msra.mxu0 %v3549_v8  ;;  %v2767_v8 = vld [vmem:[#allocation10 + $0x68] sm:$0xff] }
 0x6ff   :  { %3552 = vmatprep.subr.bf16.mxu0 %v3551_v20  ;;  %v3553_v20 = vpack.c.bf16 %v2767_v8, %v2766_v6 }
 0x702   :  { %3554 = vmatpush3.bf16.msra.mxu0 %v3553_v20 }
 0x773   :  { %v2470_v39 = vpop.xlane.xlu1 %2469 }
 0x774   :  { %v2472_v47 = vmul.f32 0.0078125, %v2470_v39  ;;  %v2468_v28 = vpop.xlane.xlu0 %2467  ;;  %v2784_v39 = vld [vmem:[#allocation10 + $0xf0] sm:$0xff] }
 0x775   :  { %v2471_v46 = vmul.f32 0.0078125, %v2468_v28 }
 0x776   :  { %v2474_v5 = vadd.f32 1e-06, %v2472_v47  ;;  %v2785_v47 = vld [vmem:[#allocation10 + $0xf8] sm:$0xff] }
 0x777   :  { %v2473_v32 = vadd.f32 1e-06, %v2471_v46  ;;  %v3555_v28 = vpack.c.bf16 %v2785_v47, %v2784_v39  ;;  %v2768_v46 = vld [vmem:[#allocation10 + $0x70] sm:$0xff] }
 0x778   :  { %3758 = vrsqrt.f32 %v2474_v5  ;;  %v2769_v5 = vld [vmem:[#allocation10 + $0x78] sm:$0xff] }
 0x779   :  { %3760 = vrsqrt.f32 %v2473_v32  ;;  %v3557_v32 = vpack.c.bf16 %v2769_v5, %v2768_v46  ;;  %3556 = vmatprep.subr.bf16.mxu0 %v3555_v28 }
 0x77b   :  { %3558 = vmatpush3.bf16.msra.mxu0 %v3557_v32 }
 0x782   :  { %v3759_v48 = vpop.eup %3758 }
 0x783   :  { %v3761_v16 = vpop.eup %3760  ;;  %v2513_v35 = vrot.slane %v3759_v48, %v4109_v22  ;;  %v2520_v58 = vrot.slane %v3759_v48, %v4112_v23  ;;  %v2527_v61 = vrot.slane %v3759_v48, %v4115_v24  ;;  %v2534_v1 = vrot.slane %v3759_v48, %v4118_v25 }
 0x784   :  { %v2485_v44 = vrot.slane %v3761_v16, %v4109_v22  ;;  %v2492_v9 = vrot.slane %v3761_v16, %v4112_v23  ;;  %v2499_v43 = vrot.slane %v3761_v16, %v4115_v24  ;;  %v2506_v11 = vrot.slane %v3761_v16, %v4118_v25 }
 0x785   :  { %v2547_v15 = vmul.f32 %v2513_v35, %v4455_v26  ;;  %v2548_v55 = vmul.f32 %v2520_v58, %v4460_v13  ;;  %v2549_v41 = vmul.f32 %v2527_v61, %v4462_v38  ;;  %v2550_v18 = vmul.f32 %v2534_v1, %v4468_v42 }
 0x786   :  { %v2543_v56 = vmul.f32 %v2485_v44, %v4458_v2  ;;  %v2544_v29 = vmul.f32 %v2492_v9, %v4464_v49  ;;  %v2545_v22 = vmul.f32 %v2499_v43, %v4466_v40  ;;  %v2546_v23 = vmul.f32 %v2506_v11, %v4474_v45 }
 0x787   :  { %v2581_v14 = vmul.f32 %v2563_v33, %v2547_v15  ;;  %v2582_v24 = vmul.f32 %v2571_v52, %v2548_v55  ;;  %v2583_v27 = vmul.f32 %v2570_v37, %v2549_v41  ;;  %v2584_v25 = vmul.f32 %v2572_v31, %v2550_v18 }
 0x788   :  { %v2577_v34 = vmul.f32 %v2563_v33, %v2543_v56  ;;  %v2578_v54 = vmul.f32 %v2571_v52, %v2544_v29  ;;  %v2579_v59 = vmul.f32 %v2570_v37, %v2545_v22  ;;  %v2580_v36 = vmul.f32 %v2572_v31, %v2546_v23 }
 0x789   :  { %v2654_v3 = vcombine.low %v2581_v14, %v2582_v24  ;;  %v2655_v7 = vcombine.low %v2583_v27, %v2584_v25 }
 0x78a   :  { %v2637_v30 = vcombine.low %v2577_v34, %v2578_v54  ;;  %v2638_v57 = vcombine.low %v2579_v59, %v2580_v36 }
 0x78b   :  { %v2662_v63 = vrot.slane %v2654_v3, %v4078_v12  ;;  %v2669_v0 = vrot.slane %v2655_v7, %v4078_v12 }
 0x78c   :  { %v2645_v62 = vrot.slane %v2637_v30, %v4078_v12  ;;  %v2652_v53 = vrot.slane %v2638_v57, %v4078_v12 }
 0x78d   :  { %v2670_v21 = vcombine.low %v2662_v63, %v2669_v0 }
 0x78e   :  { %v2653_v10 = vcombine.low %v2645_v62, %v2652_v53 }
 0x790   :  { %2738 = vmatmul.mubr.f32.vlgmr.msra.gmra.mrb[22].mxu1 %v2653_v10 }
 0x791   :  { %2743 = vmatprep.mubr.f32.mxu1 %v3924_v19  ;;  %v2622_v19 = vrot.slane %v2617_v50, %v339_v17 }
 0x794   :  { %2744 = vmatmul.mubr.f32.gmra.mrb[24].mxu1 %v2670_v21 }
 0x863   :  { %v2739_v33 = vpop.f32.mrb[22].mxu1 }
 0x864   :  { %v2740_v37 = vadd.f32 %v2739_v33, %v2622_v19  ;;  %v2741_v48 = vpop.f32.mrb[23].mxu1 }
 0x865   :  { %v2742_v52 = vadd.f32 %v2741_v48, %v2626_v51 }
 0x866   :  { %v2750_v35 = vmax.f32 %v2740_v37, 0.0 }
 0x867   :  { %v2751_v31 = vmax.f32 %v2742_v52, 0.0  ;;  %v2745_v16 = vpop.f32.mrb[24].mxu1 }
 0x868   :  { %v2746_v58 = vadd.f32 %v2745_v16, %v2622_v19  ;;  %v2747_v61 = vpop.f32.mrb[25].mxu1 }
 0x869   :  { %v2748_v1 = vadd.f32 %v2747_v61, %v2626_v51  ;;  %2857 = vmatprep.mubr.f32.mxu0 %v2751_v31 }
 0x86a   :  { %2858 = vmatmul.mubr.f32.vlgmr.msra.gmra.mrb[18].mxu0 %v2750_v35  ;;  %v2752_v9 = vmax.f32 %v2746_v58, 0.0 }
 0x86b   :  { %v2753_v44 = vmax.f32 %v2748_v1, 0.0 }
 0x86d   :  { %2862 = vmatprep.mubr.f32.mxu0 %v2753_v44 }
 0x86e   :  { %2863 = vmatmul.mubr.f32.gmra.mrb[20].mxu0 %v2752_v9 }
 0x93d   :  { %v3131_v17 = vpop.f32.mrb[18].mxu0 }
 0x93e   :  { %v3132_v60 = vpop.f32.mrb[19].mxu0 }
 0x93f   :  { %v3133_v43 = vadd.f32 %v3132_v60, %v3131_v17 }
 0x941   :  { %v2860_v11 = vadd.f32 %v3133_v43, %v2998_v4  ;;  %v3134_v15 = vpop.f32.mrb[20].mxu0 }
 0x942   :  { %v3135_v55 = vpop.f32.mrb[21].mxu0 }
 0x943   :  { %v2870_v41 = vcombine.high %v2860_v11, %v2860_v11  ;;  %v2877_v18 = vrot.slane %v2860_v11, %v4078_v12  ;;  %v3136_v56 = vadd.f32 %v3135_v55, %v3134_v15 }
 0x945   :  { %v2884_v29 = vrot.slane %v2870_v41, %v4078_v12  ;;  %v2885_v22 = vcombine.high %v2877_v18, %v2877_v18  ;;  %v2912_v23 = vadd.f32 %v2877_v18, %v4458_v2  ;;  %v2865_v14 = vadd.f32 %v3136_v56, %v2998_v4 }
 0x947   :  { %v2886_v24 = vcombine.high %v2884_v29, %v2884_v29  ;;  %v2913_v27 = vadd.f32 %v2885_v22, %v4464_v49  ;;  %v2914_v25 = vadd.f32 %v2884_v29, %v4466_v40  ;;  %2920 = vst [vmem:[#allocation11] sm:$0x3] %v2912_v23  ;;  %v2887_v34 = vcombine.high %v2865_v14, %v2865_v14 }
 0x948   :  { %v2894_v54 = vrot.slane %v2865_v14, %v4078_v12 }
 0x949   :  { %v2915_v59 = vadd.f32 %v2886_v24, %v4474_v45  ;;  %2921 = vst [vmem:[#allocation11 + $0x2] sm:$0x3] %v2913_v27  ;;  %2922 = vst [vmem:[#allocation11 + $0x4] sm:$0x3] %v2914_v25  ;;  %v2901_v36 = vrot.slane %v2887_v34, %v4078_v12 }
 0x94a   :  { %v2902_v30 = vcombine.high %v2894_v54, %v2894_v54  ;;  %v2916_v57 = vadd.f32 %v2894_v54, %v4455_v26 }
 0x94b   :  { %2923 = vst [vmem:[#allocation11 + $0x6] sm:$0x3] %v2915_v59  ;;  %v2903_v2 = vcombine.high %v2901_v36, %v2901_v36  ;;  %v2918_v49 = vadd.f32 %v2901_v36, %v4462_v38 }
 0x94c   :  { %v2917_v40 = vadd.f32 %v2902_v30, %v4460_v13  ;;  %2924 = vst [vmem:[#allocation11 + $0x8] sm:$0x3] %v2916_v57 }
 0x94d   :  { %v2919_v3 = vadd.f32 %v2903_v2, %v4468_v42  ;;  %2926 = vst [vmem:[#allocation11 + $0xc] sm:$0x3] %v2918_v49 }
 0x94e   :  { %2925 = vst [vmem:[#allocation11 + $0xa] sm:$0x3] %v2917_v40 }
 0x94f   :  { %2927 = vst [vmem:[#allocation11 + $0xe] sm:$0x3] %v2919_v3 }
 0x950   :  { %3891 = shalt.err (!%p3888_p2)
}
 0x951   :  { %s3892_s22 = scalar_lea.hbm %s4566_s11, 256 }
 0x952   :  { %p3893_p3 = scmp.ne.s32.totalorder %s4566_s11, %s3892_s22  ;;  %p3896_p4 = scmp.lt.u32.totalorder %s3892_s22, %s4566_s11 }
 0x954   :  { %p3898_p5 = pnand %p3896_p4, %p3893_p3 }
 0x956   :  { %3901 = shalt.err (!%p3898_p5)
}
 0x957   :  { %2939 = dma.vmem_to_hbm [thread:$0]  %s2934_s16, 256, %s4566_s11, [#allocation4], %s3917_s5, %s3917_s5, %s3918_s13  }
 0x958   :  { %3908 = dma.done.wait [#allocation4], 256  }
 0x959   :  { %3909 = vsyncadd [#allocation4], 4294967040 }
 0x95a   :  { %2943 = vsyncpa [#allocation3], 1 }
 0x95b   :  { %2944 = vsyncpa [#allocation6], 1 }
 0x95c   :  { %2945 = vsyncpa [#allocation9], 1 }
 0x95d   :  { %2946 = vsyncpa [#allocation4], 1 }

</bundles_post_ra>
